<compile_context>
chip_gen: v7x
topology: tpu7x:2x2x1
jax: 0.10.0
libtpu: 0.0.40
codegen_flags: <defaults>
</compile_context>

<pallas_src>
import functools

import numpy as np
import jax
import jax.numpy as jnp
from jax.experimental import pallas as pl
from jax.experimental.pallas import tpu as pltpu


_CENTER_TAP = 4  # (dy, dx) == (0, 0)


def _mish(x):
    """mish(x) = x*tanh(softplus(x)) = x*(t^2+2t)/(t^2+2t+2), t = exp(x).

    One EUP exp + one approx reciprocal (refined by one Newton step on the
    VPU).  For x > 20, mish(x) == x in f32, so the exp argument is clamped.
    """
    t = jnp.exp(jnp.minimum(x, 20.0))
    num = t * (t + 2.0)
    den = num + 2.0
    r = pl.reciprocal(den, approx=True)
    r = r * (2.0 - den * r)          # Newton step -> ~f32-exact reciprocal
    return x * num * r


def _make_convblock_kernel(img_w, cout, mxu_dtype):
    """Builds the kernel with the nine static tap shifts baked in.

    Tap order k = (dy+1)*3 + (dx+1) matches _build_tap_masks and the wrapper
    weight reshapes.
    """
    shifts = [dy * img_w + dx for dy in (-1, 0, 1) for dx in (-1, 0, 1)]

    def kernel(x_ref, masks_ref, wf_ref, bf_ref, w2_ref, b2_ref, out_ref):
        x = x_ref[...]                      # (cin_pad, SB) f32, lane dim = SB
        masks = masks_ref[...]              # (8, SB) f32 border masks (no center)
        sb = x.shape[-1]

        # Hoisted per-tap (1, SB) mask rows, shared by both 3x3 convs.
        mask_rows = []
        mi = 0
        for k in range(9):
            if k == _CENTER_TAP:
                mask_rows.append(None)      # center tap: always in-bounds
            else:
                mask_rows.append(masks[mi:mi + 1, :])
                mi += 1

        def tap(a, k):
            # (dy,dx)-shifted, zero-padded copy of a.  Shifts are XLU lane
            # rotations; the per-tap mask implements "same" zero padding and
            # also zeroes cross-image leakage in the packed slab.
            s = shifts[k]
            shifted = a if s == 0 else pltpu.roll(a, (-s) % sb, axis=1)
            if mask_rows[k] is not None:
                shifted = shifted * mask_rows[k]
            return shifted

        # ---- conv1 (3x3) fused with the 1x1 skip: one fat matmul ----------
        #   (2*Cout, 9*Cin_pad) @ (9*Cin_pad, SB)
        # rows [0:Cout]      = conv1 pre-activation
        # rows [Cout:2*Cout] = 1x1 skip (w3 embedded at the center-tap cols)
        col1 = jnp.concatenate([tap(x, k) for k in range(9)], axis=0)
        fused = jax.lax.dot_general(
            wf_ref[...], col1.astype(mxu_dtype), (((1,), (0,)), ((), ())),
            preferred_element_type=jnp.float32) + bf_ref[...]
        h1 = _mish(fused[0:cout])           # (Cout, SB)
        skip = fused[cout:2 * cout]         # (Cout, SB)

        # ---- conv2 (3x3): three tap groups of K = 3*Cout, summed ----------
        acc = None
        for g in range(3):
            colg = jnp.concatenate([tap(h1, 3 * g + j) for j in range(3)],
                                   axis=0)                    # (3*Cout, SB)
            d = jax.lax.dot_general(
                w2_ref[g], colg.astype(mxu_dtype), (((1,), (0,)), ((), ())),
                preferred_element_type=jnp.float32)
            acc = d if acc is None else acc + d
        out1 = _mish(acc + b2_ref[...])     # (Cout, SB)

        out_ref[...] = (out1 + skip).astype(out_ref.dtype)    # lane-dense store

    return kernel


def _build_tap_masks(h, w, nb):
    """(8, nb*h*w) f32 in-bounds masks for the 8 non-center taps."""
    s = h * w
    rows = np.arange(s) // w
    cols = np.arange(s) % w
    m = []
    k = 0
    for dy in (-1, 0, 1):
        for dx in (-1, 0, 1):
            if k != _CENTER_TAP:
                ok = ((rows + dy >= 0) & (rows + dy < h) &
                      (cols + dx >= 0) & (cols + dx < w))
                m.append(ok.astype(np.float32))
            k += 1
    m = np.stack(m, axis=0)                 # (8, s)
    return jnp.asarray(np.tile(m, (1, nb)))


_VMEM_LIMIT_CACHE = [None]


def _vmem_limit_bytes():
    """~75% of per-core VMEM (v5e/v6e: 128 MiB, v7x: 64 MiB); safe fallback."""
    if _VMEM_LIMIT_CACHE[0] is None:
        cap = None
        try:
            cap = getattr(pltpu.get_tpu_info(), "vmem_capacity_bytes", None)
        except Exception:
            cap = None
        if not cap:
            cap = 64 * 1024 * 1024          # conservative: v7x per-core size
        _VMEM_LIMIT_CACHE[0] = int(cap) * 3 // 4
    return _VMEM_LIMIT_CACHE[0]


def _pick_images_per_block(n, s, cin_pad, cout, vmem_limit):
    """Images per grid step: largest nb whose working set fits VMEM,
    preferring >= 2 grid steps (DMA/compute pipelining + v7x megacore)."""
    # f32 rows of lane-width SB live per grid step (conservative upper bound):
    rows = (2 * cin_pad        # double-buffered input block
            + 2 * cout         # double-buffered output block
            + 9 * cin_pad      # conv1 im2col
            + 2 * cout         # fused conv1+skip matmul result
            + cout             # h1
            + 3 * cout         # conv2 tap-group im2col
            + cout             # conv2 accumulator
            + 2 * 8)           # double-buffered border masks
    max_sb = max(1, int(vmem_limit * 0.6) // (rows * 4))

    best_nb, best_score = 0, None
    for nb in range(1, n + 1):
        if n % nb:
            continue
        sb = nb * s
        lane_ok = (sb % 128 == 0) or (nb == n)   # mult of 128, or full lane axis
        if not lane_ok or sb > max_sb:
            continue
        score = (n // nb >= 2, nb)               # prefer >=2 steps, then big nb
        if best_score is None or score > best_score:
            best_nb, best_score = nb, score
    if best_nb == 0:
        # TODO(synk): spatial (row) tiling with a 2-row halo for images whose
        # per-image working set alone exceeds the VMEM budget.
        best_nb = 1
    return best_nb


@functools.partial(jax.jit, static_argnames=("h", "w", "mxu_dtype"))
def conv_block_pallas_cm(x_cm, params, *, h, w, mxu_dtype=jnp.bfloat16):
    """Channel-major entry point: x_cm (Cin, N*H*W) f32 -> (Cout, N*H*W).

    Use this when stacking ConvBlocks so activations stay in the lane-dense
    (C, N*H*W) layout between blocks (no per-block NCHW HBM round trips).
    """
    w1, b1, w2, b2, w3, b3 = params           # HWIO weights, (Cout,) biases
    cin = x_cm.shape[0]
    cout = w1.shape[-1]
    s = h * w
    n = x_cm.shape[1] // s

    cin_pad = max(8, ((cin + 7) // 8) * 8)    # sublane-aligned input channels
    vmem_limit = _vmem_limit_bytes()
    nb = _pick_images_per_block(n, s, cin_pad, cout, vmem_limit)
    sb = nb * s
    grid = (n // nb,)

    if cin_pad != cin:                        # zero-pad channels host-side
        x_cm = jnp.pad(x_cm, ((0, cin_pad - cin), (0, 0)))

    masks = _build_tap_masks(h, w, nb)                         # (8, sb)

    # conv1 (im2col order) and the 1x1 skip fused into one weight matrix.
    w1p = jnp.pad(w1, ((0, 0), (0, 0), (0, cin_pad - cin), (0, 0)))
    w1t = jnp.transpose(w1p.reshape(9 * cin_pad, cout))        # (Cout, 9*Cin_pad)
    w3e = jnp.zeros((cout, 9 * cin_pad), jnp.float32)
    w3e = w3e.at[:, _CENTER_TAP * cin_pad:_CENTER_TAP * cin_pad + cin].set(
        jnp.transpose(w3))
    wf = jnp.concatenate([w1t, w3e], axis=0).astype(mxu_dtype)  # (2*Cout, 9*Cin_pad)
    bf = jnp.concatenate([b1, b3]).reshape(2 * cout, 1)

    # conv2 weights in 3 tap groups: (3, Cout, 3*Cout).
    w2r = w2.reshape(9, cout, cout)
    w2g = jnp.stack(
        [jnp.transpose(w2r[3 * g:3 * g + 3].reshape(3 * cout, cout))
         for g in range(3)], axis=0).astype(mxu_dtype)
    b2c = b2.reshape(cout, 1)

    def full(shape):
        zeros = (0,) * len(shape)
        return pl.BlockSpec(shape, lambda g, _z=zeros: _z)

    # TODO(synk): pipeline_mode=pl.Buffered(1) on the constant-index operands
    # below would halve their (already tiny) VMEM footprint; left at the
    # default double-buffering to keep the compile path conservative.
    out_cm = pl.pallas_call(
        _make_convblock_kernel(w, cout, mxu_dtype),
        out_shape=jax.ShapeDtypeStruct((cout, n * s), x_cm.dtype),
        grid_spec=pltpu.PrefetchScalarGridSpec(
            num_scalar_prefetch=0,
            grid=grid,
            in_specs=[
                pl.BlockSpec((cin_pad, sb), lambda g: (0, g)),   # x slab
                full((8, sb)),                                   # border masks
                full((2 * cout, 9 * cin_pad)),                   # fused w1 | w3
                full((2 * cout, 1)),                             # fused b1 | b3
                full((3, cout, 3 * cout)),                       # w2 tap groups
                full((cout, 1)),                                 # b2
            ],
            out_specs=pl.BlockSpec((cout, sb), lambda g: (0, g)),
        ),
        compiler_params=pltpu.CompilerParams(
            dimension_semantics=("parallel",),
            vmem_limit_bytes=vmem_limit),
    )(x_cm, masks, wf, bf, w2g, b2c)

    return out_cm


@functools.partial(jax.jit, static_argnames=("mxu_dtype",))
def conv_block_pallas(x_nchw, params, *, mxu_dtype=jnp.bfloat16):
    """x_nchw: (N, Cin, H, W) float32 -> (N, Cout, H, W).

    Thin NCHW adapter around conv_block_pallas_cm; when chaining many
    ConvBlocks, call the _cm entry point directly and transpose only at the
    network boundary.
    """
    n, cin, h, w = x_nchw.shape
    x_cm = jnp.transpose(x_nchw, (1, 0, 2, 3)).reshape(cin, n * h * w)
    out_cm = conv_block_pallas_cm(x_cm, params, h=h, w=w, mxu_dtype=mxu_dtype)
    cout = out_cm.shape[0]
    return jnp.transpose(out_cm.reshape(cout, n, h, w), (1, 0, 2, 3))


def conv_block_reference(x_nchw, params):
    """Pure-JAX NCHW reference mirroring the PyTorch forward."""
    w1, b1, w2, b2, w3, b3 = params
    dn = ("NCHW", "HWIO", "NCHW")

    def conv(v, w_):
        return jax.lax.conv_general_dilated(
            v, w_, (1, 1), "SAME", dimension_numbers=dn,
            precision=jax.lax.Precision.HIGHEST)

    def mish(v):
        return v * jnp.tanh(jax.nn.softplus(v))

    def bias(b):
        return b[None, :, None, None]

    hdd = mish(conv(x_nchw, w1) + bias(b1))
    hdd = mish(conv(hdd, w2) + bias(b2))
    skip = conv(x_nchw, w3.reshape(1, 1, *w3.shape)) + bias(b3)
    return hdd + skip


def init_params(key, in_channel, out_channel):
    ks = jax.random.split(key, 6)
    w1 = 0.1 * jax.random.normal(ks[0], (3, 3, in_channel, out_channel), jnp.float32)
    b1 = 0.01 * jax.random.normal(ks[1], (out_channel,), jnp.float32)
    w2 = 0.1 * jax.random.normal(ks[2], (3, 3, out_channel, out_channel), jnp.float32)
    b2 = 0.01 * jax.random.normal(ks[3], (out_channel,), jnp.float32)
    w3 = 0.1 * jax.random.normal(ks[4], (in_channel, out_channel), jnp.float32)
    b3 = 0.01 * jax.random.normal(ks[5], (out_channel,), jnp.float32)
    return (w1, b1, w2, b2, w3, b3)


if __name__ == "__main__":
    key = jax.random.PRNGKey(0)
    k_x, k_p = jax.random.split(key)

    N, Cin, H, W = 2, 3, 16, 16        # PyTorch defaults: in_channel=3
    Cout = 48                          # out_channel=48

    x_nchw = jax.random.normal(k_x, (N, Cin, H, W), jnp.float32)
    params = init_params(k_p, Cin, Cout)

    ref = jax.block_until_ready(conv_block_reference(x_nchw, params))

    # f32 MXU path: tight check against the f32 reference.
    out_f32 = jax.block_until_ready(
        conv_block_pallas(x_nchw, params, mxu_dtype=jnp.float32))
    assert out_f32.shape == (N, Cout, H, W)
    err32 = float(jnp.max(jnp.abs(out_f32 - ref)))
    assert jnp.allclose(out_f32, ref, rtol=2e-3, atol=2e-3), f"f32 mismatch: {err32}"

    # bf16 MXU path (default fast path on v5e/v6e/v7x): bf16 input rounding,
    # f32 accumulation -> looser tolerance.
    out_bf16 = jax.block_until_ready(conv_block_pallas(x_nchw, params))
    assert out_bf16.shape == (N, Cout, H, W)
    errbf = float(jnp.max(jnp.abs(out_bf16 - ref)))
    assert jnp.allclose(out_bf16, ref, rtol=5e-2, atol=5e-2), f"bf16 mismatch: {errbf}"

    print("KERNEL_OK")
</pallas_src>

<mosaic_0001>
module attributes {stable_mosaic.version = 11 : i64} {
  func.func @kernel(%arg0: i32, %arg1: memref<8x256xf32, #tpu.memory_space<vmem>>, %arg2: memref<8x256xf32, #tpu.memory_space<vmem>>, %arg3: memref<96x72xf32, #tpu.memory_space<vmem>>, %arg4: memref<96x1xf32, #tpu.memory_space<vmem>>, %arg5: memref<3x48x144xf32, #tpu.memory_space<vmem>>, %arg6: memref<48x1xf32, #tpu.memory_space<vmem>>, %arg7: memref<48x256xf32, #tpu.memory_space<vmem>>) attributes {dimension_semantics = [#tpu.dimension_semantics<parallel>], iteration_bounds = array<i64: 2>, scalar_prefetch = 0 : i64, scratch_operands = 0 : i64, tpu.core_type = #tpu.core_type<tc>, window_params = [{transform_indices = @transform_0, window_bounds = array<i64: 8, 256>}, {pipeline_mode = #tpu.pipeline_mode<synchronous>, transform_indices = @transform_1, window_bounds = array<i64: 8, 256>}, {pipeline_mode = #tpu.pipeline_mode<synchronous>, transform_indices = @transform_2, window_bounds = array<i64: 96, 72>}, {pipeline_mode = #tpu.pipeline_mode<synchronous>, transform_indices = @transform_3, window_bounds = array<i64: 96, 1>}, {pipeline_mode = #tpu.pipeline_mode<synchronous>, transform_indices = @transform_4, window_bounds = array<i64: 3, 48, 144>}, {pipeline_mode = #tpu.pipeline_mode<synchronous>, transform_indices = @transform_5, window_bounds = array<i64: 48, 1>}, {transform_indices = @transform_6, window_bounds = array<i64: 48, 256>}]} {
    %c0 = arith.constant 0 : index
    %c0_0 = arith.constant 0 : index
    %0 = vector.load %arg1[%c0, %c0_0] : memref<8x256xf32, #tpu.memory_space<vmem>>, vector<8x256xf32>
    %c0_1 = arith.constant 0 : index
    %c0_2 = arith.constant 0 : index
    %1 = vector.load %arg2[%c0_1, %c0_2] : memref<8x256xf32, #tpu.memory_space<vmem>>, vector<8x256xf32>
    %2 = vector.extract_strided_slice %1 {offsets = [0, 0], sizes = [1, 256], strides = [1, 1]} : vector<8x256xf32> to vector<1x256xf32>
    %3 = vector.extract_strided_slice %1 {offsets = [1, 0], sizes = [1, 256], strides = [1, 1]} : vector<8x256xf32> to vector<1x256xf32>
    %4 = vector.extract_strided_slice %1 {offsets = [2, 0], sizes = [1, 256], strides = [1, 1]} : vector<8x256xf32> to vector<1x256xf32>
    %5 = vector.extract_strided_slice %1 {offsets = [3, 0], sizes = [1, 256], strides = [1, 1]} : vector<8x256xf32> to vector<1x256xf32>
    %6 = vector.extract_strided_slice %1 {offsets = [4, 0], sizes = [1, 256], strides = [1, 1]} : vector<8x256xf32> to vector<1x256xf32>
    %7 = vector.extract_strided_slice %1 {offsets = [5, 0], sizes = [1, 256], strides = [1, 1]} : vector<8x256xf32> to vector<1x256xf32>
    %8 = vector.extract_strided_slice %1 {offsets = [6, 0], sizes = [1, 256], strides = [1, 1]} : vector<8x256xf32> to vector<1x256xf32>
    %9 = vector.extract_strided_slice %1 {offsets = [7, 0], sizes = [1, 256], strides = [1, 1]} : vector<8x256xf32> to vector<1x256xf32>
    %c17_i32 = arith.constant 17 : i32
    %10 = tpu.dynamic_rotate %0 by %c17_i32 dim 1 : vector<8x256xf32>, i32 -> vector<8x256xf32>
    %11 = vector.broadcast %2 : vector<1x256xf32> to vector<8x256xf32>
    %12 = arith.mulf %10, %11 : vector<8x256xf32>
    %c16_i32 = arith.constant 16 : i32
    %13 = tpu.dynamic_rotate %0 by %c16_i32 dim 1 : vector<8x256xf32>, i32 -> vector<8x256xf32>
    %14 = vector.broadcast %3 : vector<1x256xf32> to vector<8x256xf32>
    %15 = arith.mulf %13, %14 : vector<8x256xf32>
    %c15_i32 = arith.constant 15 : i32
    %16 = tpu.dynamic_rotate %0 by %c15_i32 dim 1 : vector<8x256xf32>, i32 -> vector<8x256xf32>
    %17 = vector.broadcast %4 : vector<1x256xf32> to vector<8x256xf32>
    %18 = arith.mulf %16, %17 : vector<8x256xf32>
    %c1_i32 = arith.constant 1 : i32
    %19 = tpu.dynamic_rotate %0 by %c1_i32 dim 1 : vector<8x256xf32>, i32 -> vector<8x256xf32>
    %20 = vector.broadcast %5 : vector<1x256xf32> to vector<8x256xf32>
    %21 = arith.mulf %19, %20 : vector<8x256xf32>
    %c255_i32 = arith.constant 255 : i32
    %22 = tpu.dynamic_rotate %0 by %c255_i32 dim 1 : vector<8x256xf32>, i32 -> vector<8x256xf32>
    %23 = vector.broadcast %6 : vector<1x256xf32> to vector<8x256xf32>
    %24 = arith.mulf %22, %23 : vector<8x256xf32>
    %c241_i32 = arith.constant 241 : i32
    %25 = tpu.dynamic_rotate %0 by %c241_i32 dim 1 : vector<8x256xf32>, i32 -> vector<8x256xf32>
    %26 = vector.broadcast %7 : vector<1x256xf32> to vector<8x256xf32>
    %27 = arith.mulf %25, %26 : vector<8x256xf32>
    %c240_i32 = arith.constant 240 : i32
    %28 = tpu.dynamic_rotate %0 by %c240_i32 dim 1 : vector<8x256xf32>, i32 -> vector<8x256xf32>
    %29 = vector.broadcast %8 : vector<1x256xf32> to vector<8x256xf32>
    %30 = arith.mulf %28, %29 : vector<8x256xf32>
    %c239_i32 = arith.constant 239 : i32
    %31 = tpu.dynamic_rotate %0 by %c239_i32 dim 1 : vector<8x256xf32>, i32 -> vector<8x256xf32>
    %32 = vector.broadcast %9 : vector<1x256xf32> to vector<8x256xf32>
    %33 = arith.mulf %31, %32 : vector<8x256xf32>
    %34 = tpu.concatenate %12, %15, %18, %21, %0, %24, %27, %30, %33 in 0 : vector<8x256xf32>, vector<8x256xf32>, vector<8x256xf32>, vector<8x256xf32>, vector<8x256xf32>, vector<8x256xf32>, vector<8x256xf32>, vector<8x256xf32>, vector<8x256xf32> -> vector<72x256xf32>
    %c0_3 = arith.constant 0 : index
    %c0_4 = arith.constant 0 : index
    %35 = vector.load %arg3[%c0_3, %c0_4] : memref<96x72xf32, #tpu.memory_space<vmem>>, vector<96x72xf32>
    %cst = arith.constant dense<0.000000e+00> : vector<96x256xf32>
    %36 = tpu.matmul %35, %34, %cst {dimension_numbers = #tpu.dot_dimension_numbers<[1], [0], [0], [1], [0, 0, 1, 1], [], []>} : vector<96x72xf32>, vector<72x256xf32>, vector<96x256xf32> -> vector<96x256xf32>
    %c0_5 = arith.constant 0 : index
    %c0_6 = arith.constant 0 : index
    %37 = vector.load %arg4[%c0_5, %c0_6] : memref<96x1xf32, #tpu.memory_space<vmem>>, vector<96x1xf32>
    %38 = vector.broadcast %37 : vector<96x1xf32> to vector<96x256xf32>
    %39 = arith.addf %36, %38 : vector<96x256xf32>
    %40 = vector.extract_strided_slice %39 {offsets = [0, 0], sizes = [48, 256], strides = [1, 1]} : vector<96x256xf32> to vector<48x256xf32>
    %cst_7 = arith.constant 2.000000e+01 : f32
    %41 = vector.broadcast %cst_7 : f32 to vector<48x256xf32>
    %42 = arith.minimumf %40, %41 : vector<48x256xf32>
    %43 = math.exp %42 : vector<48x256xf32>
    %cst_8 = arith.constant 2.000000e+00 : f32
    %44 = vector.broadcast %cst_8 : f32 to vector<48x256xf32>
    %45 = arith.addf %43, %44 : vector<48x256xf32>
    %46 = arith.mulf %43, %45 : vector<48x256xf32>
    %cst_9 = arith.constant 2.000000e+00 : f32
    %47 = vector.broadcast %cst_9 : f32 to vector<48x256xf32>
    %48 = arith.addf %46, %47 : vector<48x256xf32>
    %49 = tpu.reciprocal %48 {approx = true} : vector<48x256xf32> -> vector<48x256xf32>
    %50 = arith.mulf %48, %49 : vector<48x256xf32>
    %cst_10 = arith.constant 2.000000e+00 : f32
    %51 = vector.broadcast %cst_10 : f32 to vector<48x256xf32>
    %52 = arith.subf %51, %50 : vector<48x256xf32>
    %53 = arith.mulf %49, %52 : vector<48x256xf32>
    %54 = arith.mulf %40, %46 : vector<48x256xf32>
    %55 = arith.mulf %54, %53 : vector<48x256xf32>
    %56 = vector.extract_strided_slice %39 {offsets = [48, 0], sizes = [48, 256], strides = [1, 1]} : vector<96x256xf32> to vector<48x256xf32>
    %c17_i32_11 = arith.constant 17 : i32
    %57 = tpu.dynamic_rotate %55 by %c17_i32_11 dim 1 : vector<48x256xf32>, i32 -> vector<48x256xf32>
    %58 = vector.broadcast %2 : vector<1x256xf32> to vector<48x256xf32>
    %59 = arith.mulf %57, %58 : vector<48x256xf32>
    %c16_i32_12 = arith.constant 16 : i32
    %60 = tpu.dynamic_rotate %55 by %c16_i32_12 dim 1 : vector<48x256xf32>, i32 -> vector<48x256xf32>
    %61 = vector.broadcast %3 : vector<1x256xf32> to vector<48x256xf32>
    %62 = arith.mulf %60, %61 : vector<48x256xf32>
    %c15_i32_13 = arith.constant 15 : i32
    %63 = tpu.dynamic_rotate %55 by %c15_i32_13 dim 1 : vector<48x256xf32>, i32 -> vector<48x256xf32>
    %64 = vector.broadcast %4 : vector<1x256xf32> to vector<48x256xf32>
    %65 = arith.mulf %63, %64 : vector<48x256xf32>
    %66 = tpu.concatenate %59, %62, %65 in 0 : vector<48x256xf32>, vector<48x256xf32>, vector<48x256xf32> -> vector<144x256xf32>
    %c0_14 = arith.constant 0 : index
    %c0_15 = arith.constant 0 : index
    %c0_16 = arith.constant 0 : index
    %67 = vector.load %arg5[%c0_14, %c0_15, %c0_16] : memref<3x48x144xf32, #tpu.memory_space<vmem>>, vector<1x48x144xf32>
    %68 = vector.shape_cast %67 : vector<1x48x144xf32> to vector<48x144xf32>
    %cst_17 = arith.constant dense<0.000000e+00> : vector<48x256xf32>
    %69 = tpu.matmul %68, %66, %cst_17 {dimension_numbers = #tpu.dot_dimension_numbers<[1], [0], [0], [1], [0, 0, 1, 1], [], []>} : vector<48x144xf32>, vector<144x256xf32>, vector<48x256xf32> -> vector<48x256xf32>
    %c1_i32_18 = arith.constant 1 : i32
    %70 = tpu.dynamic_rotate %55 by %c1_i32_18 dim 1 : vector<48x256xf32>, i32 -> vector<48x256xf32>
    %71 = vector.broadcast %5 : vector<1x256xf32> to vector<48x256xf32>
    %72 = arith.mulf %70, %71 : vector<48x256xf32>
    %c255_i32_19 = arith.constant 255 : i32
    %73 = tpu.dynamic_rotate %55 by %c255_i32_19 dim 1 : vector<48x256xf32>, i32 -> vector<48x256xf32>
    %74 = vector.broadcast %6 : vector<1x256xf32> to vector<48x256xf32>
    %75 = arith.mulf %73, %74 : vector<48x256xf32>
    %76 = tpu.concatenate %72, %55, %75 in 0 : vector<48x256xf32>, vector<48x256xf32>, vector<48x256xf32> -> vector<144x256xf32>
    %c1 = arith.constant 1 : index
    %c0_20 = arith.constant 0 : index
    %c0_21 = arith.constant 0 : index
    %77 = vector.load %arg5[%c1, %c0_20, %c0_21] : memref<3x48x144xf32, #tpu.memory_space<vmem>>, vector<1x48x144xf32>
    %78 = vector.shape_cast %77 : vector<1x48x144xf32> to vector<48x144xf32>
    %cst_22 = arith.constant dense<0.000000e+00> : vector<48x256xf32>
    %79 = tpu.matmul %78, %76, %cst_22 {dimension_numbers = #tpu.dot_dimension_numbers<[1], [0], [0], [1], [0, 0, 1, 1], [], []>} : vector<48x144xf32>, vector<144x256xf32>, vector<48x256xf32> -> vector<48x256xf32>
    %80 = arith.addf %69, %79 : vector<48x256xf32>
    %c241_i32_23 = arith.constant 241 : i32
    %81 = tpu.dynamic_rotate %55 by %c241_i32_23 dim 1 : vector<48x256xf32>, i32 -> vector<48x256xf32>
    %82 = vector.broadcast %7 : vector<1x256xf32> to vector<48x256xf32>
    %83 = arith.mulf %81, %82 : vector<48x256xf32>
    %c240_i32_24 = arith.constant 240 : i32
    %84 = tpu.dynamic_rotate %55 by %c240_i32_24 dim 1 : vector<48x256xf32>, i32 -> vector<48x256xf32>
    %85 = vector.broadcast %8 : vector<1x256xf32> to vector<48x256xf32>
    %86 = arith.mulf %84, %85 : vector<48x256xf32>
    %c239_i32_25 = arith.constant 239 : i32
    %87 = tpu.dynamic_rotate %55 by %c239_i32_25 dim 1 : vector<48x256xf32>, i32 -> vector<48x256xf32>
    %88 = vector.broadcast %9 : vector<1x256xf32> to vector<48x256xf32>
    %89 = arith.mulf %87, %88 : vector<48x256xf32>
    %90 = tpu.concatenate %83, %86, %89 in 0 : vector<48x256xf32>, vector<48x256xf32>, vector<48x256xf32> -> vector<144x256xf32>
    %c2 = arith.constant 2 : index
    %c0_26 = arith.constant 0 : index
    %c0_27 = arith.constant 0 : index
    %91 = vector.load %arg5[%c2, %c0_26, %c0_27] : memref<3x48x144xf32, #tpu.memory_space<vmem>>, vector<1x48x144xf32>
    %92 = vector.shape_cast %91 : vector<1x48x144xf32> to vector<48x144xf32>
    %cst_28 = arith.constant dense<0.000000e+00> : vector<48x256xf32>
    %93 = tpu.matmul %92, %90, %cst_28 {dimension_numbers = #tpu.dot_dimension_numbers<[1], [0], [0], [1], [0, 0, 1, 1], [], []>} : vector<48x144xf32>, vector<144x256xf32>, vector<48x256xf32> -> vector<48x256xf32>
    %94 = arith.addf %80, %93 : vector<48x256xf32>
    %c0_29 = arith.constant 0 : index
    %c0_30 = arith.constant 0 : index
    %95 = vector.load %arg6[%c0_29, %c0_30] : memref<48x1xf32, #tpu.memory_space<vmem>>, vector<48x1xf32>
    %96 = vector.broadcast %95 : vector<48x1xf32> to vector<48x256xf32>
    %97 = arith.addf %94, %96 : vector<48x256xf32>
    %cst_31 = arith.constant 2.000000e+01 : f32
    %98 = vector.broadcast %cst_31 : f32 to vector<48x256xf32>
    %99 = arith.minimumf %97, %98 : vector<48x256xf32>
    %100 = math.exp %99 : vector<48x256xf32>
    %cst_32 = arith.constant 2.000000e+00 : f32
    %101 = vector.broadcast %cst_32 : f32 to vector<48x256xf32>
    %102 = arith.addf %100, %101 : vector<48x256xf32>
    %103 = arith.mulf %100, %102 : vector<48x256xf32>
    %cst_33 = arith.constant 2.000000e+00 : f32
    %104 = vector.broadcast %cst_33 : f32 to vector<48x256xf32>
    %105 = arith.addf %103, %104 : vector<48x256xf32>
    %106 = tpu.reciprocal %105 {approx = true} : vector<48x256xf32> -> vector<48x256xf32>
    %107 = arith.mulf %105, %106 : vector<48x256xf32>
    %cst_34 = arith.constant 2.000000e+00 : f32
    %108 = vector.broadcast %cst_34 : f32 to vector<48x256xf32>
    %109 = arith.subf %108, %107 : vector<48x256xf32>
    %110 = arith.mulf %106, %109 : vector<48x256xf32>
    %111 = arith.mulf %97, %103 : vector<48x256xf32>
    %112 = arith.mulf %111, %110 : vector<48x256xf32>
    %113 = arith.addf %112, %56 : vector<48x256xf32>
    %c0_35 = arith.constant 0 : index
    %c0_36 = arith.constant 0 : index
    %114 = vector.load %arg7[%c0_35, %c0_36] : memref<48x256xf32, #tpu.memory_space<vmem>>, vector<48x256xf32>
    tpu.vector_store %arg7[%c0_35, %c0_36], %113 {strides = array<i32>} : memref<48x256xf32, #tpu.memory_space<vmem>>, vector<48x256xf32>,
    return
  }
  func.func @transform_0(%arg0: i32) -> (i32, i32) {
    %c0_i32 = arith.constant 0 : i32
    %c0_i32_0 = arith.constant 0 : i32
    return %c0_i32, %arg0 : i32, i32
  }
  func.func @transform_1(%arg0: i32) -> (i32, i32) {
    %c0_i32 = arith.constant 0 : i32
    %c0_i32_0 = arith.constant 0 : i32
    %c0_i32_1 = arith.constant 0 : i32
    return %c0_i32, %c0_i32_0 : i32, i32
  }
  func.func @transform_2(%arg0: i32) -> (i32, i32) {
    %c0_i32 = arith.constant 0 : i32
    %c0_i32_0 = arith.constant 0 : i32
    %c0_i32_1 = arith.constant 0 : i32
    return %c0_i32, %c0_i32_0 : i32, i32
  }
  func.func @transform_3(%arg0: i32) -> (i32, i32) {
    %c0_i32 = arith.constant 0 : i32
    %c0_i32_0 = arith.constant 0 : i32
    %c0_i32_1 = arith.constant 0 : i32
    return %c0_i32, %c0_i32_0 : i32, i32
  }
  func.func @transform_4(%arg0: i32) -> (i32, i32, i32) {
    %c0_i32 = arith.constant 0 : i32
    %c0_i32_0 = arith.constant 0 : i32
    %c0_i32_1 = arith.constant 0 : i32
    %c0_i32_2 = arith.constant 0 : i32
    return %c0_i32, %c0_i32_0, %c0_i32_1 : i32, i32, i32
  }
  func.func @transform_5(%arg0: i32) -> (i32, i32) {
    %c0_i32 = arith.constant 0 : i32
    %c0_i32_0 = arith.constant 0 : i32
    %c0_i32_1 = arith.constant 0 : i32
    return %c0_i32, %c0_i32_0 : i32, i32
  }
  func.func @transform_6(%arg0: i32) -> (i32, i32) {
    %c0_i32 = arith.constant 0 : i32
    %c0_i32_0 = arith.constant 0 : i32
    return %c0_i32, %arg0 : i32, i32
  }
}

</mosaic_0001>

<bundles_post_ra>
// kernel: conv_block_pallas_cm.1
= control target key start
LH: loop header
LB: loop body
LE: loop exit
PB: predicated region body
PF: predicated region fallthrough
CT: control target
= control target key end

     0   :  { %11 = vsyncpa [#allocation3], 0  ;;  %s3921_s0 = inlined_call_operand.vmem [shape: f32[8,512], index: 0, kind: input, shape index: {}]   ;;  %s3922_s1 = inlined_call_operand.vmem [shape: f32[8,256], index: 1, kind: input, shape index: {}]   ;;  %s3923_s2 = inlined_call_operand.vmem [shape: f32[96,72], index: 2, kind: input, shape index: {}]   ;;  %s3924_s3 = inlined_call_operand.vmem [shape: f32[96,1], index: 3, kind: input, shape index: {}]   ;;  %s3925_s4 = inlined_call_operand.vmem [shape: f32[3,48,144], index: 4, kind: input, shape index: {}]   ;;  %s3926_s5 = inlined_call_operand.vmem [shape: f32[48,1], index: 5, kind: input, shape index: {}]   ;;  %s3927_s6 = inlined_call_operand.hbm [shape: f32[48,512], index: 6, kind: output, shape index: {}]  }
   0x1   :  { %13 = vsyncpa [#allocation3 + $0x1], 0  ;;  %s2356_s21 = smov 0   ;;  %s2358_s22 = smov 0  }
   0x2   :  { %s2360_s23 = smov 0   ;;  %s2362_s24 = smov 0  }
   0x3 LB: > { %s2377_s25 = sadd.s32 4294967295, %s2306_s24   ;;  %s1881_s26 = sadd.s32 4294967294, %s2306_s24   ;;  %s2306_s24 = sphi %s2362_s24, %s4068_s24   ;;  %s2302_s23 = sphi %s2360_s23, %s4067_s23   ;;  %s2298_s22 = sphi %s2358_s22, %s4066_s22   ;;  %s2294_s21 = sphi %s2356_s21, %s4065_s21  }
   0x4   : > { %s2381_s27 = sadd.s32 1, %s2306_s24   ;;  %s157_s28 = sadd.s32 1, %s2302_s23 }
   0x5   : > { %s154_s29 = ssub.s32 %s2306_s24, %s2381_s27  ;;  %p167_p0 = scmp.ne.s32.totalorder %s2302_s23, %s2298_s22 }
   0x6   : > { %p155_p1 = scmp.eq.s32.totalorder %s154_s29, 0  ;;  %p168_p2 = scmp.eq.s32.totalorder %s2377_s25, 1 }
   0x7   : > { %p173_p3 = scmp.ne.s32.totalorder %s2298_s22, %s2294_s21  ;;  %p174_p4 = scmp.eq.s32.totalorder %s1881_s26, 1 }
   0x8   : > { %s2392_s30 = scalar_select %p155_p1, %s2302_s23, %s157_s28  }
   0x9   : > { %p2394_p5 = por %p168_p2, %p167_p0  ;;  %p2398_p6 = por %p174_p4, %p173_p3 }
   0xa   : > { %p1884_p7 = scmp.ge.s32.totalorder %s2306_s24, 1  ;;  %p216_p8 = scmp.lt.s32.totalorder %s2306_s24, 3 }
   0xc   : > { %p217_p9 = pnand %p1884_p7, %p216_p8 }
   0xe   : > { %220 = sbr.rel (%p217_p9) target bundleno = 1049 (0x419), region = 44 }
  0x15   : > { %s1885_s9 = sshll.u32 %s2377_s25, 1  ;;  %s2308_s14 = smov 16   ;;  %v2314_v2 = vmov 0.0   ;;  %v408_v3 = vld [vmem:[%s3924_s3 + $0x8] sm:$0xff]  ;;  %v407_v4 = vld [vmem:[%s3924_s3] sm:$0xff]  ;;  %v2317_v5 = vmov 0   ;;  %v261_v10 = vlaneseq }
  0x16   : > { %p247_p10 = scmp.lt.s32.totalorder %s1885_s9, 3  ;;  %s2309_s15 = smov 17   ;;  %580 = vmatprep.mubr.f32.mxu0 %v2314_v2  ;;  %2147 = vset.pattern.permute.xlu1 %v2317_v5  ;;  %v409_v6 = vld [vmem:[%s3924_s3 + $0x10] sm:$0xff]  ;;  %v410_v7 = vld [vmem:[%s3924_s3 + $0x18] sm:$0xff]  ;;  %v411_v8 = vld [vmem:[%s3924_s3 + $0x20] sm:$0xff]  ;;  %vm479_vm8 = vcmask 588800  }
  0x17   : > { %s2310_s16 = smov 15   ;;  %s2311_s17 = smov 1   ;;  %2146 = vset.pattern.permute.xlu0 %v2317_v5  ;;  %v412_v9 = vld [vmem:[%s3924_s3 + $0x28] sm:$0xff]  ;;  %v2463_v11 = vshrl.u32 %v261_v10, 7  ;;  %v2465_v12 = vand.u32 127, %v261_v10  ;;  %v2472_v15 = vld [vmem:[%s3922_s1] sm:$0xff] }
  0x18   : > { %s4070_s9 = smov (!%p247_p10, %s1885_s9), 3  ;;  %s3928_s18 = smov 127   ;;  %v2477_v16 = vld [vmem:[%s3922_s1 + $0x8] sm:$0xff]  ;;  %vm1062_vm9 = vcmask 130048  }
  0x19   : > { %s1886_s10 = sshll.u32 %s4070_s9, 3  ;;  %s2313_s19 = smov 113   ;;  %v268_v13 = vsub.s32 0, %v2463_v11  ;;  %v285_v14 = vsub.s32 1, %v2463_v11  ;;  %vm280_vm0 = vcmp.lt.s32.totalorder %v2465_v12, 16  ;;  %vm263_vm1 = vcmp.lt.s32.totalorder %v2465_v12, 17 }
  0x1a   : > { %s250_s13 = scalar_lea.vmem %s3921_s0, %s1886_s10  ;;  %s2315_s20 = smov 112   ;;  %v302_v25 = vsub.s32 2, %v2463_v11  ;;  %v319_v26 = vsub.s32 3, %v2463_v11  ;;  %vm297_vm2 = vcmp.lt.s32.totalorder %v2465_v12, 15  ;;  %v336_v40 = vsub.s32 4, %v2463_v11 }
  0x1b   : > { %v2408_v0 = vld [vmem:[%s250_s13] sm:$0xff]  ;;  %v2414_v1 = vld [vmem:[%s250_s13 + $0x8] sm:$0xff]  ;;  %s2316_s26 = smov 111   ;;  %v2482_v19 = vrot.slane %v2477_v16, %v268_v13  ;;  %v2485_v20 = vrot.slane %v2477_v16, %v285_v14  ;;  %v2488_v21 = vrot.slane %v2472_v15, %v268_v13  ;;  %v2491_v22 = vrot.slane %v2472_v15, %v285_v14  ;;  %s3972_s28 = smov 127  }
  0x1c   : > { %276 = vrot.lane.b32.xlu1 %v2408_v0, %s2308_s14  ;;  %257 = vrot.lane.b32.xlu0 %v2408_v0, %s2309_s15  ;;  %v2509_v39 = vrot.slane %v2472_v15, %v302_v25  ;;  %v2513_v41 = vrot.slane %v2477_v16, %v302_v25  ;;  %vm314_vm3 = vcmp.lt.s32.totalorder %v2465_v12, 1  ;;  %v2517_v42 = vrot.slane %v2472_v15, %v319_v26  ;;  %s243_s13 = sand.u32 1, %s2298_s22   ;;  %s1945_s29 = sshll.u32 %s2377_s25, 8 }
  0x1d   : > { %v2520_v43 = vrot.slane %v2477_v16, %v319_v26  ;;  %vm331_vm4 = vcmp.lt.s32.totalorder %v2465_v12, 127  ;;  %v2532_v50 = vrot.slane %v2472_v15, %v336_v40  ;;  %v2535_v51 = vrot.slane %v2477_v16, %v336_v40  ;;  %v397_v40 = vld [vmem:[%s3923_s2 + $0x10] sm:$0xff]  ;;  %s3879_s25 = scalar_lea.sflag [#allocation3], %s243_s13  ;;  %s2318_s10 = smov [#allocation2]  }
  0x1e   : > { %v353_v62 = vsub.s32 5, %v2463_v11  ;;  %vm348_vm5 = vcmp.lt.s32.totalorder %v2465_v12, 113  ;;  %v387_v10 = vsub.s32 7, %v2463_v11  ;;  %vm365_vm6 = vcmp.lt.s32.totalorder %v2465_v12, 112 }
  0x1f   : > { %3966 = vst [vmem:[#allocation5_spill] sm:$0xff] %v2532_v50  ;;  %3967 = vst [vmem:[#allocation6_spill] sm:$0xff] %v2535_v51  ;;  %vm382_vm7 = vcmp.lt.s32.totalorder %v2465_v12, 111  ;;  %v1902_v12 = vld [vmem:[%s3925_s4 + $0x78] sm:$0xff] }
  0x20   : > { %278 = vrot.lane.b32.xlu1 %v2414_v1, %s2308_s14  ;;  %259 = vrot.lane.b32.xlu0 %v2414_v1, %s2309_s15  ;;  %v2557_v13 = vrot.slane %v2477_v16, %v353_v62  ;;  %v2576_v25 = vrot.slane %v2477_v16, %v387_v10 }
  0x22   : > { %3970 = vst [vmem:[#allocation9_spill] sm:$0xff] %v2576_v25 }
  0x24   : > { %295 = vrot.lane.b32.xlu1 %v2414_v1, %s2310_s16  ;;  %293 = vrot.lane.b32.xlu0 %v2408_v0, %s2310_s16 }
  0x28   : > { %312 = vrot.lane.b32.xlu1 %v2414_v1, %s2311_s17  ;;  %310 = vrot.lane.b32.xlu0 %v2408_v0, %s2311_s17 }
  0x2c   : > { %329 = vrot.lane.b32.xlu1 %v2414_v1, %s3928_s18  ;;  %327 = vrot.lane.b32.xlu0 %v2408_v0, %s3928_s18  ;;  %s2248_s18 = sshll.u32 %s2318_s10, 4  ;;  %s2249_s18 = int_to_ptr.vmem [resolvable:$false] %s2248_s18 }
  0x2d   : > { %s2250_s11 = scalar_lea.vmem %s2249_s18, 3072 }
  0x30   : > { %346 = vrot.lane.b32.xlu1 %v2414_v1, %s2313_s19  ;;  %344 = vrot.lane.b32.xlu0 %v2408_v0, %s2313_s19 }
  0x34   : > { %363 = vrot.lane.b32.xlu1 %v2414_v1, %s2315_s20  ;;  %361 = vrot.lane.b32.xlu0 %v2408_v0, %s2315_s20 }
  0x38   : > { %380 = vrot.lane.b32.xlu1 %v2414_v1, %s2316_s26  ;;  %378 = vrot.lane.b32.xlu0 %v2408_v0, %s2316_s26 }
  0x3c   : > { %426 = vperm.xlu1 %2147, %v408_v3   ;;  %421 = vperm.xlu0 %2146, %v407_v4   ;;  %v370_v4 = vsub.s32 6, %v2463_v11 }
  0x3e   : > { %v2561_v14 = vrot.slane %v2472_v15, %v370_v4 }
  0x40   : > { %431 = vperm.xlu1 %2147, %v409_v6   ;;  %436 = vperm.xlu0 %2146, %v410_v7   ;;  %3968 = vst [vmem:[#allocation7_spill] sm:$0xff] %v2561_v14 }
  0x44   : > { %441 = vperm.xlu1 %2147, %v411_v8   ;;  %446 = vperm.xlu0 %2146, %v412_v9   ;;  %v2553_v9 = vrot.slane %v2472_v15, %v353_v62 }
  0x8e   : > { %v277_v17 = vpop.permute.xlu1 %276  ;;  %v258_v18 = vpop.permute.xlu0 %257 }
  0x92   : > { %v279_v23 = vpop.permute.xlu1 %278  ;;  %v260_v24 = vpop.permute.xlu0 %259 }
  0x93   : > { %v282_v27 = vsel %vm280_vm0, %v279_v23, %v277_v17  ;;  %v265_v28 = vsel %vm263_vm1, %v260_v24, %v258_v18  ;;  %v264_v29 = vsel %vm263_vm1, %v258_v18, %v260_v24  ;;  %v281_v30 = vsel %vm280_vm0, %v277_v17, %v279_v23 }
  0x94   : > { %v275_v31 = vmul.f32 %v2482_v19, %v264_v29  ;;  %v292_v32 = vmul.f32 %v2485_v20, %v281_v30  ;;  %v274_v33 = vmul.f32 %v2488_v21, %v265_v28  ;;  %v291_v34 = vmul.f32 %v2491_v22, %v282_v27 }
  0x95   : > { %v2564_v17 = vrot.slane %v2477_v16, %v370_v4  ;;  %v2583_v30 = vrot.slane %v2472_v15, %v387_v10  ;;  %v395_v15 = vld [vmem:[%s3923_s2] sm:$0xff] }
  0x96   : > { %v296_v35 = vpop.permute.xlu1 %295  ;;  %v294_v36 = vpop.permute.xlu0 %293  ;;  %v1946_v37 = vpack.c.bf16 %v292_v32, %v275_v31  ;;  %v1948_v38 = vpack.c.bf16 %v291_v34, %v274_v33 }
  0x97   : > { %v298_v44 = vsel %vm297_vm2, %v294_v36, %v296_v35  ;;  %v299_v45 = vsel %vm297_vm2, %v296_v35, %v294_v36  ;;  %3969 = vst [vmem:[#allocation8_spill] sm:$0xff] %v2564_v17  ;;  %3971 = vst [vmem:[#allocation10_spill] sm:$0xff] %v2583_v30 }
  0x98   : > { %1947 = vmatprep.subr.bf16.mxu0 %v1946_v37  ;;  %v308_v52 = vmul.f32 %v2509_v39, %v299_v45  ;;  %v309_v53 = vmul.f32 %v2513_v41, %v298_v44  ;;  %v398_v44 = vld [vmem:[%s3923_s2 + $0x18] sm:$0xff]  ;;  %v399_v45 = vld [vmem:[%s3923_s2 + $0x20] sm:$0xff] }
  0x99   : > { %1949 = vmatpush1.bf16.msra.mxu0 %v1948_v38  ;;  %v396_v38 = vld [vmem:[%s3923_s2 + $0x8] sm:$0xff] }
  0x9a   : > { %v313_v46 = vpop.permute.xlu1 %312  ;;  %v311_v47 = vpop.permute.xlu0 %310 }
  0x9b   : > { %v315_v48 = vsel %vm314_vm3, %v311_v47, %v313_v46  ;;  %v316_v49 = vsel %vm314_vm3, %v313_v46, %v311_v47  ;;  %v400_v46 = vld [vmem:[%s3923_s2 + $0x28] sm:$0xff] }
  0x9c   : > { %v325_v54 = vmul.f32 %v2517_v42, %v316_v49  ;;  %v326_v55 = vmul.f32 %v2520_v43, %v315_v48 }
  0x9e   : > { %v330_v56 = vpop.permute.xlu1 %329  ;;  %v328_v57 = vpop.permute.xlu0 %327  ;;  %v1950_v58 = vpack.c.bf16 %v326_v55, %v309_v53  ;;  %v1952_v59 = vpack.c.bf16 %v325_v54, %v308_v52 }
  0x9f   : > { %v332_v60 = vsel %vm331_vm4, %v328_v57, %v330_v56  ;;  %v333_v61 = vsel %vm331_vm4, %v330_v56, %v328_v57 }
  0xa0   : > { %v342_v63 = vmul.f32 %v2532_v50, %v332_v60  ;;  %v343_v3 = vmul.f32 %v2535_v51, %v333_v61  ;;  %1951 = vmatprep.subr.bf16.mxu0 %v1950_v58 }
  0xa1   : > { %1953 = vmatpush1.bf16.msra.mxu0 %v1952_v59 }
  0xa2   : > { %v347_v5 = vpop.permute.xlu1 %346  ;;  %v345_v6 = vpop.permute.xlu0 %344  ;;  %v1954_v7 = vpack.c.bf16 %v343_v3, %v2414_v1  ;;  %v1956_v8 = vpack.c.bf16 %v342_v63, %v2408_v0 }
  0xa3   : > { %v349_v0 = vsel %vm348_vm5, %v345_v6, %v347_v5  ;;  %v350_v1 = vsel %vm348_vm5, %v347_v5, %v345_v6 }
  0xa4   : > { %1955 = vmatprep.subr.bf16.mxu0 %v1954_v7  ;;  %v359_v26 = vmul.f32 %v2553_v9, %v349_v0  ;;  %v360_v27 = vmul.f32 %v2557_v13, %v350_v1 }
  0xa5   : > { %1957 = vmatpush1.bf16.msra.mxu0 %v1956_v8 }
  0xa6   : > { %v364_v11 = vpop.permute.xlu1 %363  ;;  %v362_v18 = vpop.permute.xlu0 %361 }
  0xa7   : > { %v366_v23 = vsel %vm365_vm6, %v362_v18, %v364_v11  ;;  %v367_v24 = vsel %vm365_vm6, %v364_v11, %v362_v18 }
  0xa8   : > { %v376_v28 = vmul.f32 %v2561_v14, %v366_v23  ;;  %v377_v29 = vmul.f32 %v2564_v17, %v367_v24 }
  0xaa   : > { %v381_v31 = vpop.permute.xlu1 %380  ;;  %v1958_v32 = vpack.c.bf16 %v377_v29, %v360_v27  ;;  %v379_v33 = vpop.permute.xlu0 %378  ;;  %v1960_v34 = vpack.c.bf16 %v376_v28, %v359_v26 }
  0xab   : > { %v383_v35 = vsel %vm382_vm7, %v379_v33, %v381_v31  ;;  %v384_v16 = vsel %vm382_vm7, %v381_v31, %v379_v33  ;;  %v401_v31 = vld [vmem:[%s3923_s2 + $0x30] sm:$0xff] }
  0xac   : > { %1959 = vmatprep.subr.bf16.mxu0 %v1958_v32  ;;  %v394_v36 = vmul.f32 %v2576_v25, %v384_v16  ;;  %v393_v37 = vmul.f32 %v2583_v30, %v383_v35  ;;  %v402_v35 = vld [vmem:[%s3923_s2 + $0x38] sm:$0xff] }
  0xad   : > { %1961 = vmatpush1.bf16.msra.mxu0 %v1960_v34  ;;  %v1592_v30 = vld [vmem:[%s3926_s5 + $0x18] sm:$0xff] }
  0xae   : > { %532 = vmatprep.subr.mxu0 %v394_v36 }
  0xb1   : > { %533 = vmatpush1.msra.mxu0 %v393_v37 }
  0xb2   : > { %1887 = vmatmul.mubr.msk.f32.vlgmr.msra.gmra.mrb[0].mxu0 %vm479_vm8, %v395_v15  ;;  %v403_v15 = vld [vmem:[%s3923_s2 + $0x40] sm:$0xff] }
  0xb3   : > { %586 = vmatprep.mubr.f32.mxu0 %v2314_v2 }
  0xb6   : > { %1888 = vmatmul.mubr.msk.f32.gmra.mrb[2].mxu0 %vm479_vm8, %v396_v38 }
  0xb7   : > { %592 = vmatprep.mubr.f32.mxu0 %v2314_v2 }
  0xba   : > { %1889 = vmatmul.mubr.msk.f32.gmra.mrb[4].mxu0 %vm479_vm8, %v397_v40 }
  0xbb   : > { %598 = vmatprep.mubr.f32.mxu0 %v2314_v2  ;;  %v422_v48 = vpop.permute.xlu0 %421  ;;  %v427_v54 = vpop.permute.xlu1 %426 }
  0xbe   : > { %1890 = vmatmul.mubr.msk.f32.gmra.mrb[6].mxu0 %vm479_vm8, %v398_v44 }
  0xbf   : > { %604 = vmatprep.mubr.f32.mxu0 %v2314_v2  ;;  %v432_v37 = vpop.permute.xlu1 %431 }
  0xc2   : > { %1891 = vmatmul.mubr.msk.f32.gmra.mrb[8].mxu0 %vm479_vm8, %v399_v45 }
  0xc3   : > { %610 = vmatprep.mubr.f32.mxu0 %v2314_v2 }
  0xc6   : > { %1892 = vmatmul.mubr.msk.f32.gmra.mrb[10].mxu0 %vm479_vm8, %v400_v46 }
  0xc7   : > { %616 = vmatprep.mubr.f32.mxu0 %v2314_v2 }
  0xca   : > { %1893 = vmatmul.mubr.msk.f32.gmra.mrb[12].mxu0 %vm479_vm8, %v401_v31 }
  0xcb   : > { %622 = vmatprep.mubr.f32.mxu0 %v2314_v2 }
  0xce   : > { %1894 = vmatmul.mubr.msk.f32.gmra.mrb[14].mxu0 %vm479_vm8, %v402_v35 }
  0xcf   : > { %628 = vmatprep.mubr.f32.mxu0 %v2314_v2 }
  0xd2   : > { %1895 = vmatmul.mubr.msk.f32.gmra.mrb[16].mxu0 %vm479_vm8, %v403_v15 }
  0xd3   : > { %634 = vmatprep.mubr.f32.mxu0 %v2314_v2 }
 0x185   : > { %v582_v47 = vpop.f32.mrb[0].mxu0 }
 0x186   : > { %v2621_v49 = vadd.f32 %v582_v47, %v422_v48  ;;  %v584_v52 = vpop.f32.mrb[1].mxu0 }
 0x187   : > { %v2626_v59 = vadd.f32 %v584_v52, %v422_v48  ;;  %v404_v48 = vld [vmem:[%s3923_s2 + $0x48] sm:$0xff] }
 0x188   : > { %v653_v53 = vmin.f32 %v2621_v49, 20.0  ;;  %1896 = vmatmul.mubr.msk.f32.gmra.mrb[18].mxu0 %vm479_vm8, %v404_v48 }
 0x189   : > { %v588_v55 = vpop.f32.mrb[2].mxu0  ;;  %v654_v3 = vmin.f32 %v2626_v59, 20.0  ;;  %640 = vmatprep.mubr.f32.mxu0 %v2314_v2 }
 0x18a   : > { %v665_v56 = vmul.f32 1.442695, %v653_v53  ;;  %v2624_v57 = vadd.f32 %v588_v55, %v427_v54  ;;  %v590_v58 = vpop.f32.mrb[3].mxu0  ;;  %v437_v53 = vpop.permute.xlu0 %436 }
 0x18b   : > { %v2632_v4 = vadd.f32 %v590_v58, %v427_v54  ;;  %v667_v7 = vmul.f32 1.442695, %v654_v3 }
 0x18c   : > { %2148 = vpow2.f32 %v665_v56  ;;  %v655_v60 = vmin.f32 %v2624_v57, 20.0 }
 0x18d   : > { %v594_v61 = vpop.f32.mrb[4].mxu0  ;;  %v656_v8 = vmin.f32 %v2632_v4, 20.0 }
 0x18e   : > { %v669_v62 = vmul.f32 1.442695, %v655_v60  ;;  %v2629_v63 = vpop.f32.mrb[5].mxu0  ;;  %v2658_v40 = vadd.f32 %v594_v61, %v432_v37 }
 0x18f   : > { %v671_v18 = vmul.f32 1.442695, %v656_v8  ;;  %v405_v8 = vld [vmem:[%s3923_s2 + $0x50] sm:$0xff] }
 0x190   : > { %2150 = vpow2.f32 %v669_v62  ;;  %v657_v54 = vmin.f32 %v2658_v40, 20.0  ;;  %1897 = vmatmul.mubr.msk.f32.gmra.mrb[20].mxu0 %vm479_vm8, %v405_v8 }
 0x191   : > { %v600_v5 = vpop.f32.mrb[6].mxu0  ;;  %2152 = vpow2.f32 %v667_v7  ;;  %646 = vmatprep.mubr.f32.mxu0 %v2314_v2 }
 0x192   : > { %v2634_v6 = vpop.f32.mrb[7].mxu0  ;;  %2154 = vpow2.f32 %v671_v18  ;;  %v2668_v60 = vadd.f32 %v600_v5, %v437_v53 }
 0x193   : > { %v2709_v15 = vadd.f32 %v2634_v6, %v437_v53 }
 0x194   : > { %v659_v5 = vmin.f32 %v2668_v60, 20.0 }
 0x195   : > { %v2637_v10 = vpop.f32.mrb[8].mxu0  ;;  %v660_v48 = vmin.f32 %v2709_v15, 20.0 }
 0x196   : > { %v2149_v0 = vpop.eup %2148  ;;  %v2639_v1 = vpop.f32.mrb[9].mxu0 }
 0x197   : > { %v689_v11 = vadd.f32 2.0, %v2149_v0 }
 0x199   : > { %v701_v23 = vmul.f32 %v2149_v0, %v689_v11  ;;  %v2641_v24 = vpop.f32.mrb[10].mxu0 }
 0x19a   : > { %v2151_v26 = vpop.eup %2150  ;;  %v2643_v27 = vpop.f32.mrb[11].mxu0 }
 0x19b   : > { %v713_v28 = vadd.f32 2.0, %v701_v23  ;;  %v691_v29 = vadd.f32 2.0, %v2151_v26  ;;  %v2153_v34 = vpop.eup %2152  ;;  %v773_v56 = vmul.f32 %v701_v23, %v2621_v49  ;;  %v673_v49 = vmul.f32 1.442695, %v657_v54 }
 0x19c   : > { %v690_v16 = vadd.f32 2.0, %v2153_v34  ;;  %v2155_v36 = vpop.eup %2154 }
 0x19d   : > { %2156 = vrcp.f32 %v713_v28  ;;  %v703_v32 = vmul.f32 %v2151_v26, %v691_v29  ;;  %v692_v46 = vadd.f32 2.0, %v2155_v36  ;;  %v406_v26 = vld [vmem:[%s3923_s2 + $0x58] sm:$0xff] }
 0x19e   : > { %v702_v45 = vmul.f32 %v2153_v34, %v690_v16  ;;  %1898 = vmatmul.mubr.msk.f32.gmra.mrb[22].mxu0 %vm479_vm8, %v406_v26 }
 0x19f   : > { %v715_v33 = vadd.f32 2.0, %v703_v32  ;;  %v704_v62 = vmul.f32 %v2155_v36, %v692_v46  ;;  %v775_v11 = vmul.f32 %v703_v32, %v2624_v57  ;;  %v677_v57 = vmul.f32 1.442695, %v659_v5 }
 0x1a0   : > { %v714_v61 = vadd.f32 2.0, %v702_v45  ;;  %v2701_v32 = vadd.f32 %v2629_v63, %v432_v37  ;;  %v774_v46 = vmul.f32 %v702_v45, %v2626_v59 }
 0x1a1   : > { %2158 = vrcp.f32 %v715_v33  ;;  %v716_v18 = vadd.f32 2.0, %v704_v62 }
 0x1a2   : > { %2160 = vrcp.f32 %v714_v61  ;;  %v658_v36 = vmin.f32 %v2701_v32, 20.0 }
 0x1a3   : > { %2162 = vpow2.f32 %v673_v49  ;;  %v447_v49 = vpop.permute.xlu0 %446 }
 0x1a4   : > { %2164 = vrcp.f32 %v716_v18 }
 0x1a5   : > { %2166 = vpow2.f32 %v677_v57 }
 0x1a7   : > { %v2157_v38 = vpop.eup %2156 }
 0x1a8   : > { %v737_v44 = vmul.f32 %v2157_v38, %v713_v28 }
 0x1aa   : > { %v749_v47 = vsub.f32 2.0, %v737_v44 }
 0x1ab   : > { %v2159_v52 = vpop.eup %2158 }
 0x1ac   : > { %v761_v55 = vmul.f32 %v2157_v38, %v749_v47  ;;  %v739_v58 = vmul.f32 %v2159_v52, %v715_v33  ;;  %v2161_v2 = vpop.eup %2160  ;;  %v675_v47 = vmul.f32 1.442695, %v658_v36 }
 0x1ad   : > { %v2163_v28 = vpop.eup %2162  ;;  %v738_v29 = vmul.f32 %v2161_v2, %v714_v61  ;;  %v442_v61 = vpop.permute.xlu1 %441 }
 0x1ae   : > { %v2671_v3 = vmul.f32 %v773_v56, %v761_v55  ;;  %v751_v7 = vsub.f32 2.0, %v739_v58  ;;  %v2165_v31 = vpop.eup %2164  ;;  %v693_v33 = vadd.f32 2.0, %v2163_v28  ;;  %v776_v55 = vmul.f32 %v704_v62, %v2632_v4 }
 0x1af   : > { %v2167_v34 = vpop.eup %2166  ;;  %v750_v35 = vsub.f32 2.0, %v738_v29  ;;  %v740_v16 = vmul.f32 %v2165_v31, %v716_v18  ;;  %2168 = vpow2.f32 %v675_v47  ;;  %v679_v56 = vmul.f32 1.442695, %v660_v48 }
 0x1b0   : > { %v763_v0 = vmul.f32 %v2159_v52, %v751_v7  ;;  %797 = vrot.lane.b32.xlu1 %v2671_v3, %s2309_s15  ;;  %v705_v63 = vmul.f32 %v2163_v28, %v693_v33  ;;  %v695_v37 = vadd.f32 2.0, %v2167_v34  ;;  %v2739_v62 = vadd.f32 %v2637_v10, %v442_v61 }
 0x1b1   : > { %v762_v38 = vmul.f32 %v2161_v2, %v750_v35  ;;  %v752_v44 = vsub.f32 2.0, %v740_v16  ;;  %v2747_v18 = vadd.f32 %v2641_v24, %v447_v49 }
 0x1b2   : > { %v2682_v23 = vmul.f32 %v775_v11, %v763_v0  ;;  %v717_v6 = vadd.f32 2.0, %v705_v63  ;;  %v707_v52 = vmul.f32 %v2167_v34, %v695_v37  ;;  %v661_v5 = vmin.f32 %v2739_v62, 20.0 }
 0x1b3   : > { %v2721_v53 = vmul.f32 %v774_v46, %v762_v38  ;;  %v764_v54 = vmul.f32 %v2165_v31, %v752_v44  ;;  %v663_v29 = vmin.f32 %v2747_v18, 20.0  ;;  %v777_v35 = vmul.f32 %v705_v63, %v2658_v40 }
 0x1b4   : > { %799 = vrot.lane.b32.xlu0 %v2682_v23, %s2309_s15  ;;  %845 = vrot.lane.b32.xlu1 %v2671_v3, %s2308_s14  ;;  %2170 = vrcp.f32 %v717_v6  ;;  %v719_v59 = vadd.f32 2.0, %v707_v52  ;;  %v681_v28 = vmul.f32 1.442695, %v661_v5  ;;  %v779_v44 = vmul.f32 %v707_v52, %v2668_v60 }
 0x1b5   : > { %v2728_v45 = vmul.f32 %v776_v55, %v764_v54  ;;  %2172 = vpow2.f32 %v679_v56  ;;  %v685_v16 = vmul.f32 1.442695, %v663_v29  ;;  %v2777_v60 = vadd.f32 %v2639_v1, %v442_v61 }
 0x1b6   : > { %2174 = vrcp.f32 %v719_v59  ;;  %v2785_v55 = vadd.f32 %v2643_v27, %v447_v49 }
 0x1b7   : > { %2176 = vpow2.f32 %v681_v28  ;;  %v662_v54 = vmin.f32 %v2777_v60, 20.0 }
 0x1b8   : > { %847 = vrot.lane.b32.xlu0 %v2682_v23, %s2308_s14  ;;  %893 = vrot.lane.b32.xlu1 %v2671_v3, %s2310_s16  ;;  %v664_v61 = vmin.f32 %v2785_v55, 20.0 }
 0x1b9   : > { %v2169_v4 = vpop.eup %2168 }
 0x1ba   : > { %v694_v7 = vadd.f32 2.0, %v2169_v4  ;;  %v687_v49 = vmul.f32 1.442695, %v664_v61 }
 0x1bc   : > { %895 = vrot.lane.b32.xlu0 %v2682_v23, %s2310_s16  ;;  %953 = vrot.lane.b32.xlu1 %v2671_v3, %s2311_s17  ;;  %v706_v10 = vmul.f32 %v2169_v4, %v694_v7 }
 0x1be   : > { %v2171_v58 = vpop.eup %2170  ;;  %v718_v24 = vadd.f32 2.0, %v706_v10 }
 0x1bf   : > { %v2173_v8 = vpop.eup %2172  ;;  %v741_v0 = vmul.f32 %v2171_v58, %v717_v6 }
 0x1c0   : > { %955 = vrot.lane.b32.xlu0 %v2682_v23, %s2311_s17  ;;  %1301 = vrot.lane.b32.xlu1 %v2671_v3, %s2313_s19  ;;  %v2175_v11 = vpop.eup %2174  ;;  %v696_v26 = vadd.f32 2.0, %v2173_v8  ;;  %2178 = vrcp.f32 %v718_v24 }
 0x1c1   : > { %v753_v57 = vsub.f32 2.0, %v741_v0  ;;  %v743_v2 = vmul.f32 %v2175_v11, %v719_v59  ;;  %2180 = vpow2.f32 %v685_v16  ;;  %v2177_v63 = vpop.eup %2176 }
 0x1c2   : > { %v708_v31 = vmul.f32 %v2173_v8, %v696_v26  ;;  %v697_v47 = vadd.f32 2.0, %v2177_v63 }
 0x1c3   : > { %v765_v33 = vmul.f32 %v2171_v58, %v753_v57  ;;  %v755_v34 = vsub.f32 2.0, %v743_v2  ;;  %v683_v58 = vmul.f32 1.442695, %v662_v54 }
 0x1c4   : > { %1303 = vrot.lane.b32.xlu0 %v2682_v23, %s2313_s19  ;;  %1349 = vrot.lane.b32.xlu1 %v2671_v3, %s2315_s20  ;;  %v720_v36 = vadd.f32 2.0, %v708_v31  ;;  %v709_v1 = vmul.f32 %v2177_v63, %v697_v47  ;;  %v780_v2 = vmul.f32 %v708_v31, %v2709_v15 }
 0x1c5   : > { %v2763_v37 = vmul.f32 %v777_v35, %v765_v33  ;;  %v767_v38 = vmul.f32 %v2175_v11, %v755_v34  ;;  %v778_v11 = vmul.f32 %v706_v10, %v2701_v32 }
 0x1c6   : > { %2182 = vrcp.f32 %v720_v36  ;;  %v721_v27 = vadd.f32 2.0, %v709_v1 }
 0x1c7   : > { %3973 = vst [vmem:[#allocation11_spill] sm:$0xff] %v2763_v37  ;;  %v2770_v40 = vmul.f32 %v779_v44, %v767_v38  ;;  %2184 = vpow2.f32 %v683_v58 }
 0x1c8   : > { %1351 = vrot.lane.b32.xlu0 %v2682_v23, %s2315_s20  ;;  %1001 = vrot.lane.b32.xlu1 %v2671_v3, %s3972_s28  ;;  %2186 = vrcp.f32 %v721_v27 }
 0x1c9   : > { %3974 = vst [vmem:[#allocation12_spill] sm:$0xff] %v2770_v40  ;;  %2188 = vpow2.f32 %v687_v49 }
 0x1ca   : > { %v2179_v46 = vpop.eup %2178 }
 0x1cb   : > { %v2181_v48 = vpop.eup %2180  ;;  %v742_v6 = vmul.f32 %v2179_v46, %v718_v24 }
 0x1cc   : > { %1003 = vrot.lane.b32.xlu0 %v2682_v23, %s3972_s28  ;;  %809 = vrot.lane.b32.xlu1 %v2721_v53, %s2309_s15  ;;  %v699_v56 = vadd.f32 2.0, %v2181_v48 }
 0x1cd   : > { %v754_v59 = vsub.f32 2.0, %v742_v6 }
 0x1ce   : > { %v711_v7 = vmul.f32 %v2181_v48, %v699_v56 }
 0x1cf   : > { %v766_v8 = vmul.f32 %v2179_v46, %v754_v59  ;;  %v781_v46 = vmul.f32 %v709_v1, %v2739_v62 }
 0x1d0   : > { %811 = vrot.lane.b32.xlu0 %v2728_v45, %s2309_s15  ;;  %857 = vrot.lane.b32.xlu1 %v2721_v53, %s2308_s14  ;;  %v2183_v52 = vpop.eup %2182  ;;  %v723_v5 = vadd.f32 2.0, %v711_v7 }
 0x1d1   : > { %v744_v4 = vmul.f32 %v2183_v52, %v720_v36  ;;  %v2801_v26 = vmul.f32 %v778_v11, %v766_v8  ;;  %v2185_v10 = vpop.eup %2184 }
 0x1d2   : > { %2190 = vrcp.f32 %v723_v5  ;;  %v2187_v28 = vpop.eup %2186  ;;  %v698_v15 = vadd.f32 2.0, %v2185_v10 }
 0x1d3   : > { %v756_v0 = vsub.f32 2.0, %v744_v4  ;;  %v2189_v29 = vpop.eup %2188  ;;  %v745_v24 = vmul.f32 %v2187_v28, %v721_v27 }
 0x1d4   : > { %859 = vrot.lane.b32.xlu0 %v2728_v45, %s2308_s14  ;;  %905 = vrot.lane.b32.xlu1 %v2721_v53, %s2310_s16  ;;  %v710_v33 = vmul.f32 %v2185_v10, %v698_v15  ;;  %v700_v34 = vadd.f32 2.0, %v2189_v29 }
 0x1d5   : > { %v768_v57 = vmul.f32 %v2183_v52, %v756_v0  ;;  %v757_v35 = vsub.f32 2.0, %v745_v24  ;;  %v783_v52 = vmul.f32 %v711_v7, %v2747_v18 }
 0x1d6   : > { %v722_v36 = vadd.f32 2.0, %v710_v33  ;;  %v712_v38 = vmul.f32 %v2189_v29, %v700_v34  ;;  %v782_v11 = vmul.f32 %v710_v33, %v2777_v60 }
 0x1d7   : > { %v2808_v32 = vmul.f32 %v780_v2, %v768_v57  ;;  %v769_v44 = vmul.f32 %v2187_v28, %v757_v35 }
 0x1d8   : > { %907 = vrot.lane.b32.xlu0 %v2728_v45, %s2310_s16  ;;  %965 = vrot.lane.b32.xlu1 %v2721_v53, %s2311_s17  ;;  %2192 = vrcp.f32 %v722_v36  ;;  %v724_v47 = vadd.f32 2.0, %v712_v38  ;;  %v784_v10 = vmul.f32 %v712_v38, %v2785_v55 }
 0x1d9   : > { %3975 = vst [vmem:[#allocation13_spill] sm:$0xff] %v2808_v32  ;;  %v2831_v48 = vmul.f32 %v781_v46, %v769_v44 }
 0x1da   : > { %2194 = vrcp.f32 %v724_v47 }
 0x1db   : > { %3976 = vst [vmem:[#allocation14_spill] sm:$0xff] %v2831_v48 }
 0x1dc   : > { %967 = vrot.lane.b32.xlu0 %v2728_v45, %s2311_s17  ;;  %1313 = vrot.lane.b32.xlu1 %v2721_v53, %s2313_s19  ;;  %v2191_v31 = vpop.eup %2190 }
 0x1dd   : > { %v747_v16 = vmul.f32 %v2191_v31, %v723_v5 }
 0x1df   : > { %v759_v63 = vsub.f32 2.0, %v747_v16 }
 0x1e0   : > { %1315 = vrot.lane.b32.xlu0 %v2728_v45, %s2313_s19  ;;  %1361 = vrot.lane.b32.xlu1 %v2721_v53, %s2315_s20 }
 0x1e1   : > { %v771_v6 = vmul.f32 %v2191_v31, %v759_v63 }
 0x1e2   : > { %v2193_v54 = vpop.eup %2192 }
 0x1e3   : > { %v2838_v62 = vmul.f32 %v783_v52, %v771_v6  ;;  %v746_v18 = vmul.f32 %v2193_v54, %v722_v36 }
 0x1e4   : > { %1363 = vrot.lane.b32.xlu0 %v2728_v45, %s2315_s20  ;;  %1013 = vrot.lane.b32.xlu1 %v2721_v53, %s3972_s28  ;;  %v2195_v56 = vpop.eup %2194 }
 0x1e5   : > { %3977 = vst [vmem:[#allocation15_spill] sm:$0xff] %v2838_v62  ;;  %v758_v59 = vsub.f32 2.0, %v746_v18  ;;  %v748_v4 = vmul.f32 %v2195_v56, %v724_v47 }
 0x1e7   : > { %v770_v27 = vmul.f32 %v2193_v54, %v758_v59  ;;  %v760_v7 = vsub.f32 2.0, %v748_v4 }
 0x1e8   : > { %1015 = vrot.lane.b32.xlu0 %v2728_v45, %s3972_s28  ;;  %801 = vrot.lane.b32.xlu1 %v2763_v37, %s2309_s15 }
 0x1e9   : > { %v2861_v49 = vmul.f32 %v782_v11, %v770_v27  ;;  %v772_v5 = vmul.f32 %v2195_v56, %v760_v7 }
 0x1eb   : > { %3978 = vst [vmem:[#allocation16_spill] sm:$0xff] %v2861_v49  ;;  %v2870_v60 = vmul.f32 %v784_v10, %v772_v5 }
 0x1ec   : > { %849 = vrot.lane.b32.xlu1 %v2763_v37, %s2308_s14  ;;  %803 = vrot.lane.b32.xlu0 %v2770_v40, %s2309_s15 }
 0x1ed   : > { %3979 = vst [vmem:[#allocation17_spill] sm:$0xff] %v2870_v60 }
 0x1f0   : > { %897 = vrot.lane.b32.xlu1 %v2763_v37, %s2310_s16  ;;  %851 = vrot.lane.b32.xlu0 %v2770_v40, %s2308_s14 }
 0x1f4   : > { %957 = vrot.lane.b32.xlu1 %v2763_v37, %s2311_s17  ;;  %899 = vrot.lane.b32.xlu0 %v2770_v40, %s2310_s16 }
 0x1f8   : > { %1305 = vrot.lane.b32.xlu1 %v2763_v37, %s2313_s19  ;;  %959 = vrot.lane.b32.xlu0 %v2770_v40, %s2311_s17 }
 0x1fc   : > { %1353 = vrot.lane.b32.xlu1 %v2763_v37, %s2315_s20  ;;  %1307 = vrot.lane.b32.xlu0 %v2770_v40, %s2313_s19 }
 0x200   : > { %813 = vrot.lane.b32.xlu1 %v2801_v26, %s2309_s15  ;;  %1355 = vrot.lane.b32.xlu0 %v2770_v40, %s2315_s20 }
 0x204   : > { %861 = vrot.lane.b32.xlu1 %v2801_v26, %s2308_s14  ;;  %815 = vrot.lane.b32.xlu0 %v2808_v32, %s2309_s15 }
 0x208   : > { %909 = vrot.lane.b32.xlu1 %v2801_v26, %s2310_s16  ;;  %863 = vrot.lane.b32.xlu0 %v2808_v32, %s2308_s14 }
 0x20c   : > { %969 = vrot.lane.b32.xlu1 %v2801_v26, %s2311_s17  ;;  %911 = vrot.lane.b32.xlu0 %v2808_v32, %s2310_s16 }
 0x210   : > { %1317 = vrot.lane.b32.xlu1 %v2801_v26, %s2313_s19  ;;  %971 = vrot.lane.b32.xlu0 %v2808_v32, %s2311_s17 }
 0x214   : > { %1365 = vrot.lane.b32.xlu1 %v2801_v26, %s2315_s20  ;;  %1319 = vrot.lane.b32.xlu0 %v2808_v32, %s2313_s19 }
 0x218   : > { %805 = vrot.lane.b32.xlu1 %v2831_v48, %s2309_s15  ;;  %1367 = vrot.lane.b32.xlu0 %v2808_v32, %s2315_s20 }
 0x21c   : > { %853 = vrot.lane.b32.xlu1 %v2831_v48, %s2308_s14  ;;  %807 = vrot.lane.b32.xlu0 %v2838_v62, %s2309_s15 }
 0x220   : > { %901 = vrot.lane.b32.xlu1 %v2831_v48, %s2310_s16  ;;  %855 = vrot.lane.b32.xlu0 %v2838_v62, %s2308_s14 }
 0x222   : > { %v798_v1 = vpop.permute.xlu1 %797 }
 0x224   : > { %961 = vrot.lane.b32.xlu1 %v2831_v48, %s2311_s17  ;;  %903 = vrot.lane.b32.xlu0 %v2838_v62, %s2310_s16 }
 0x226   : > { %v846_v58 = vpop.permute.xlu1 %845  ;;  %v800_v61 = vpop.permute.xlu0 %799 }
 0x228   : > { %1309 = vrot.lane.b32.xlu1 %v2831_v48, %s2313_s19  ;;  %963 = vrot.lane.b32.xlu0 %v2838_v62, %s2311_s17 }
 0x22a   : > { %v894_v8 = vpop.permute.xlu1 %893  ;;  %v848_v0 = vpop.permute.xlu0 %847 }
 0x22c   : > { %1357 = vrot.lane.b32.xlu1 %v2831_v48, %s2315_s20  ;;  %1311 = vrot.lane.b32.xlu0 %v2838_v62, %s2313_s19 }
 0x22e   : > { %v2863_v57 = vpop.permute.xlu1 %953  ;;  %v896_v2 = vpop.permute.xlu0 %895 }
 0x230   : > { %817 = vrot.lane.b32.xlu1 %v2861_v49, %s2309_s15  ;;  %1359 = vrot.lane.b32.xlu0 %v2838_v62, %s2315_s20 }
 0x232   : > { %v2872_v28 = vpop.permute.xlu1 %1301  ;;  %v2874_v15 = vpop.permute.xlu0 %955 }
 0x234   : > { %1397 = vrot.lane.b32.xlu1 %v2671_v3, %s2316_s26  ;;  %819 = vrot.lane.b32.xlu0 %v2870_v60, %s2309_s15 }
 0x236   : > { %v2880_v29 = vpop.permute.xlu1 %1349  ;;  %v2882_v55 = vpop.permute.xlu0 %1303 }
 0x238   : > { %865 = vrot.lane.b32.xlu1 %v2861_v49, %s2308_s14  ;;  %1399 = vrot.lane.b32.xlu0 %v2682_v23, %s2316_s26 }
 0x23a   : > { %v2888_v24 = vpop.permute.xlu1 %1001  ;;  %v2890_v31 = vpop.permute.xlu0 %1351 }
 0x23c   : > { %913 = vrot.lane.b32.xlu1 %v2861_v49, %s2310_s16  ;;  %1411 = vrot.lane.b32.xlu0 %v2728_v45, %s2316_s26 }
 0x23e   : > { %v810_v33 = vpop.permute.xlu1 %809  ;;  %v2896_v34 = vpop.permute.xlu0 %1003 }
 0x23f   : > { %v827_v36 = vsel %vm263_vm1, %v810_v33, %v798_v1  ;;  %v821_v63 = vsel %vm263_vm1, %v798_v1, %v810_v33 }
 0x240   : > { %973 = vrot.lane.b32.xlu1 %v2861_v49, %s2311_s17  ;;  %867 = vrot.lane.b32.xlu0 %v2870_v60, %s2308_s14  ;;  %v833_v54 = vmul.f32 %v827_v36, %v2488_v21 }
 0x242   : > { %v858_v35 = vpop.permute.xlu1 %857  ;;  %v812_v16 = vpop.permute.xlu0 %811 }
 0x243   : > { %v822_v38 = vsel %vm263_vm1, %v800_v61, %v812_v16  ;;  %v828_v44 = vsel %vm263_vm1, %v812_v16, %v800_v61  ;;  %v875_v46 = vsel %vm280_vm0, %v858_v35, %v846_v58  ;;  %v869_v6 = vsel %vm280_vm0, %v846_v58, %v858_v35  ;;  %v1591_v16 = vld [vmem:[%s3926_s5 + $0x10] sm:$0xff] }
 0x244   : > { %v835_v47 = vmul.f32 %v828_v44, %v2488_v21  ;;  %1321 = vrot.lane.b32.xlu1 %v2861_v49, %s2313_s19  ;;  %1007 = vrot.lane.b32.xlu0 %v2770_v40, %s3972_s28  ;;  %v836_v52 = vmul.f32 %v822_v38, %v2482_v19  ;;  %v2922_v56 = vmul.f32 %v875_v46, %v2491_v22 }
 0x245   : > { %v834_v61 = vmul.f32 %v821_v63, %v2482_v19  ;;  %v2930_v27 = vmul.f32 %v869_v6, %v2485_v20 }
 0x246   : > { %v906_v18 = vpop.permute.xlu1 %905  ;;  %v860_v1 = vpop.permute.xlu0 %859  ;;  %v2000_v11 = vpack.c.bf16 %v835_v47, %v833_v54 }
 0x247   : > { %v870_v59 = vsel %vm280_vm0, %v848_v0, %v860_v1  ;;  %v876_v4 = vsel %vm280_vm0, %v860_v1, %v848_v0  ;;  %v917_v5 = vsel %vm297_vm2, %v894_v8, %v906_v18  ;;  %v923_v0 = vsel %vm297_vm2, %v906_v18, %v894_v8  ;;  %v942_v8 = vld [vmem:[%s3925_s4 + $0x8] sm:$0xff]  ;;  %v1589_v1 = vld [vmem:[%s3926_s5] sm:$0xff] }
 0x248   : > { %v2933_v58 = vmul.f32 %v876_v4, %v2491_v22  ;;  %v2936_v7 = vmul.f32 %v870_v59, %v2485_v20  ;;  %1369 = vrot.lane.b32.xlu1 %v2861_v49, %s2315_s20  ;;  %1019 = vrot.lane.b32.xlu0 %v2808_v32, %s3972_s28  ;;  %v1998_v10 = vpack.c.bf16 %v836_v52, %v834_v61 }
 0x249   : > { %v2958_v63 = vmul.f32 %v923_v0, %v2509_v39  ;;  %v2961_v46 = vmul.f32 %v917_v5, %v2513_v41  ;;  %1917 = vmatprep.mubr.msk.f32.mxu1 %vm1062_vm9, %v942_v8 }
 0x24a   : > { %v966_v33 = vpop.permute.xlu1 %965  ;;  %v908_v35 = vpop.permute.xlu0 %907  ;;  %1999 = vmatprep.subr.bf16.mxu1 %v1998_v10 }
 0x24b   : > { %v918_v38 = vsel %vm297_vm2, %v896_v2, %v908_v35  ;;  %v924_v44 = vsel %vm297_vm2, %v908_v35, %v896_v2  ;;  %2001 = vmatpush1.bf16.msra.mxu1 %v2000_v11  ;;  %v977_v2 = vsel %vm314_vm3, %v2863_v57, %v966_v33  ;;  %v983_v52 = vsel %vm314_vm3, %v966_v33, %v2863_v57 }
 0x24c   : > { %v2964_v47 = vmul.f32 %v924_v44, %v2509_v39  ;;  %v2967_v6 = vmul.f32 %v918_v38, %v2513_v41  ;;  %1409 = vrot.lane.b32.xlu1 %v2721_v53, %s2316_s26  ;;  %915 = vrot.lane.b32.xlu0 %v2870_v60, %s2310_s16  ;;  %v989_v61 = vmul.f32 %v983_v52, %v2517_v42 }
 0x24d   : > { %v990_v11 = vmul.f32 %v977_v2, %v2520_v43 }
 0x24e   : > { %v1314_v54 = vpop.permute.xlu1 %1313  ;;  %v968_v18 = vpop.permute.xlu0 %967 }
 0x24f   : > { %v978_v57 = vsel %vm314_vm3, %v2874_v15, %v968_v18  ;;  %v984_v4 = vsel %vm314_vm3, %v968_v18, %v2874_v15  ;;  %v1325_v10 = vsel %vm348_vm5, %v2872_v28, %v1314_v54  ;;  %v1331_v33 = vsel %vm348_vm5, %v1314_v54, %v2872_v28 }
 0x250   : > { %v991_v5 = vmul.f32 %v984_v4, %v2517_v42  ;;  %v992_v0 = vmul.f32 %v978_v57, %v2520_v43  ;;  %1005 = vrot.lane.b32.xlu1 %v2763_v37, %s3972_s28  ;;  %1403 = vrot.lane.b32.xlu0 %v2770_v40, %s2316_s26  ;;  %v3017_v54 = vmul.f32 %v1325_v10, %v2553_v9 }
 0x251   : > { %v3020_v18 = vmul.f32 %v1331_v33, %v2557_v13 }
 0x252   : > { %v1964_v15 = vpack.c.bf16 %v991_v5, %v989_v61  ;;  %v1362_v35 = vpop.permute.xlu1 %1361  ;;  %v1316_v38 = vpop.permute.xlu0 %1315  ;;  %v1962_v44 = vpack.c.bf16 %v992_v0, %v990_v11 }
 0x253   : > { %v1373_v8 = vsel %vm365_vm6, %v2880_v29, %v1362_v35  ;;  %v1379_v2 = vsel %vm365_vm6, %v1362_v35, %v2880_v29  ;;  %v1326_v28 = vsel %vm348_vm5, %v2882_v55, %v1316_v38  ;;  %v1332_v52 = vsel %vm348_vm5, %v1316_v38, %v2882_v55  ;;  %v1900_v29 = vld [vmem:[%s3925_s4 + $0x68] sm:$0xff] }
 0x254   : > { %v3023_v57 = vmul.f32 %v1326_v28, %v2553_v9  ;;  %v3026_v4 = vmul.f32 %v1332_v52, %v2557_v13  ;;  %1963 = vmatprep.subr.bf16.mxu0 %v1962_v44  ;;  %1017 = vrot.lane.b32.xlu1 %v2801_v26, %s3972_s28  ;;  %v3052_v35 = vmul.f32 %v1379_v2, %v2564_v17 }
 0x255   : > { %975 = vrot.lane.b32.xlu0 %v2870_v60, %s2311_s17  ;;  %1965 = vmatpush1.bf16.msra.mxu0 %v1964_v15  ;;  %v3049_v15 = vmul.f32 %v1373_v8, %v2561_v14 }
 0x256   : > { %v1014_v55 = vpop.permute.xlu1 %1013  ;;  %v1364_v61 = vpop.permute.xlu0 %1363  ;;  %3981 = vst [vmem:[#allocation19_spill] sm:$0xff] %v3052_v35  ;;  %1911 = vmatprep.mubr.msk.f32.mxu0 %vm1062_vm9, %v1900_v29 }
 0x257   : > { %v1025_v5 = vsel %vm331_vm4, %v2888_v24, %v1014_v55  ;;  %v1031_v0 = vsel %vm331_vm4, %v1014_v55, %v2888_v24  ;;  %v1374_v10 = vsel %vm365_vm6, %v2890_v31, %v1364_v61  ;;  %v1380_v33 = vsel %vm365_vm6, %v1364_v61, %v2890_v31  ;;  %3980 = vst [vmem:[#allocation18_spill] sm:$0xff] %v3049_v15 }
 0x258   : > { %v3055_v38 = vmul.f32 %v1374_v10, %v2561_v14  ;;  %v3058_v44 = vmul.f32 %v1380_v33, %v2564_v17  ;;  %1401 = vrot.lane.b32.xlu1 %v2763_v37, %s2316_s26  ;;  %v3075_v55 = vmul.f32 %v1025_v5, %v2532_v50  ;;  %v3078_v61 = vmul.f32 %v1031_v0, %v2535_v51 }
 0x259   : > { %1323 = vrot.lane.b32.xlu0 %v2870_v60, %s2313_s19 }
 0x25a   : > { %3982 = vst [vmem:[#allocation20_spill] sm:$0xff] %v3055_v38  ;;  %3983 = vst [vmem:[#allocation21_spill] sm:$0xff] %v3058_v44  ;;  %v802_v31 = vpop.permute.xlu1 %801  ;;  %v1016_v8 = vpop.permute.xlu0 %1015 }
 0x25b   : > { %v1026_v28 = vsel %vm331_vm4, %v2896_v34, %v1016_v8  ;;  %v1032_v52 = vsel %vm331_vm4, %v1016_v8, %v2896_v34  ;;  %3984 = vst [vmem:[#allocation22_spill] sm:$0xff] %v3075_v55  ;;  %3985 = vst [vmem:[#allocation23_spill] sm:$0xff] %v3078_v61  ;;  %v1590_v55 = vld [vmem:[%s3926_s5 + $0x8] sm:$0xff] }
 0x25c   : > { %v3081_v10 = vmul.f32 %v1026_v28, %v2532_v50  ;;  %v3084_v33 = vmul.f32 %v1032_v52, %v2535_v51  ;;  %1413 = vrot.lane.b32.xlu1 %v2801_v26, %s2316_s26  ;;  %v1593_v50 = vld [vmem:[%s3926_s5 + $0x20] sm:$0xff] }
 0x25d   : > { %1415 = vrot.lane.b32.xlu0 %v2808_v32, %s2316_s26  ;;  %v4007_v32 = vpack.c.bf16 %v2936_v7, %v2930_v27 }
 0x25e   : > { %3986 = vst [vmem:[#allocation24_spill] sm:$0xff] %v3081_v10  ;;  %3987 = vst [vmem:[#allocation25_spill] sm:$0xff] %v3084_v33  ;;  %v850_v5 = vpop.permute.xlu1 %849  ;;  %v804_v8 = vpop.permute.xlu0 %803 }
 0x260   : > { %1009 = vrot.lane.b32.xlu1 %v2831_v48, %s3972_s28 }
 0x261   : > { %1011 = vrot.lane.b32.xlu0 %v2838_v62, %s3972_s28 }
 0x262   : > { %v898_v28 = vpop.permute.xlu1 %897  ;;  %v852_v52 = vpop.permute.xlu0 %851 }
 0x264   : > { %1021 = vrot.lane.b32.xlu1 %v2861_v49, %s3972_s28 }
 0x265   : > { %1371 = vrot.lane.b32.xlu0 %v2870_v60, %s2315_s20  ;;  %s3872_s20 = scalar_lea.hbm %s3927_s6, %s1945_s29 }
 0x266   : > { %v3102_v34 = vpop.permute.xlu1 %957  ;;  %v3104_v24 = vpop.permute.xlu0 %899 }
 0x268   : > { %1405 = vrot.lane.b32.xlu1 %v2831_v48, %s2316_s26 }
 0x269   : > { %1407 = vrot.lane.b32.xlu0 %v2838_v62, %s2316_s26 }
 0x26a   : > { %v3110_v0 = vpop.permute.xlu1 %1305  ;;  %v3112_v2 = vpop.permute.xlu0 %959 }
 0x26c   : > { %1417 = vrot.lane.b32.xlu1 %v2861_v49, %s2316_s26 }
 0x26d   : > { %1023 = vrot.lane.b32.xlu0 %v2870_v60, %s3972_s28  ;;  %s3799_s28 = smul.u32 96, %s243_s13 }
 0x26e   : > { %v3122_v11 = vpop.permute.xlu1 %1353  ;;  %v3124_v59 = vpop.permute.xlu0 %1307 }
 0x26f   : > { %s3822_s15 = scalar_lea.vmem [#allocation2], %s3799_s28 }
 0x270   : > { %1597 = vperm.xlu1 %2147, %v1589_v1   ;;  %s1819_s16 = sshll.u32 %s3822_s15, 4  ;;  %s3874_s16 = int_to_ptr.vmem [resolvable:$true] %s1819_s16 }
 0x271   : > { %1419 = vrot.lane.b32.xlu0 %v2870_v60, %s2316_s26  ;;  %v3161_v60 = vpop.f32.mrb[12].mxu0  ;;  %s2244_s9 = scalar_lea.vmem %s3874_s16, 1536  ;;  %p2251_p0 = scmp.lt.s32.totalorder %s3874_s16, %s2249_s18 }
 0x272   : > { %v814_v36 = vpop.permute.xlu1 %813  ;;  %v3131_v29 = vpop.permute.xlu0 %1355  ;;  %3988 = vst [vmem:[#allocation26_spill] sm:$0xff] %v3161_v60  ;;  %p2245_p11 = scmp.ne.s32.totalorder %s3874_s16, %s2244_s9  ;;  %p2252_p1 = scmp.lt.s32.totalorder %s2250_s11, %s2244_s9 }
 0x273   : > { %v823_v10 = vsel %vm263_vm1, %v802_v31, %v814_v36  ;;  %v829_v1 = vsel %vm263_vm1, %v814_v36, %v802_v31 }
 0x274   : > { %1607 = vperm.xlu1 %2147, %v1591_v16   ;;  %v837_v36 = vmul.f32 %v829_v1, %v2488_v21  ;;  %v838_v16 = vmul.f32 %v823_v10, %v2482_v19  ;;  %v413_v10 = vld [vmem:[%s3924_s3 + $0x30] sm:$0xff]  ;;  %p2246_p12 = pnand %p2245_p11, %p2394_p5  ;;  %p2253_p2 = por %p2252_p1, %p2251_p0 }
 0x275   : > { %1602 = vperm.xlu0 %2146, %v1590_v55  }
 0x276   : > { %v862_v61 = vpop.permute.xlu1 %861  ;;  %v816_v33 = vpop.permute.xlu0 %815  ;;  %p2247_p13 = pneg %p2246_p12 }
 0x277   : > { %v824_v51 = vsel %vm263_vm1, %v804_v8, %v816_v33  ;;  %v830_v25 = vsel %vm263_vm1, %v816_v33, %v804_v8  ;;  %v871_v15 = vsel %vm280_vm0, %v850_v5, %v862_v61  ;;  %v877_v38 = vsel %vm280_vm0, %v862_v61, %v850_v5 }
 0x278   : > { %v839_v31 = vmul.f32 %v830_v25, %v2488_v21  ;;  %v840_v55 = vmul.f32 %v824_v51, %v2482_v19  ;;  %1617 = vperm.xlu1 %2147, %v1593_v50   ;;  %v1594_v51 = vld [vmem:[%s3926_s5 + $0x28] sm:$0xff]  ;;  %v3176_v61 = vmul.f32 %v877_v38, %v2491_v22  ;;  %v3179_v5 = vmul.f32 %v871_v15, %v2485_v20  ;;  %p2254_p3 = pnand %p2253_p2, %p2247_p13 }
 0x279   : > { %1612 = vperm.xlu0 %2146, %v1592_v30   ;;  %v3173_v30 = vpop.f32.mrb[13].mxu0 }
 0x27a   : > { %v910_v49 = vpop.permute.xlu1 %909  ;;  %v864_v33 = vpop.permute.xlu0 %863  ;;  %v2002_v25 = vpack.c.bf16 %v840_v55, %v838_v16  ;;  %v2004_v8 = vpack.c.bf16 %v839_v31, %v837_v36  ;;  %3989 = vst [vmem:[#allocation27_spill] sm:$0xff] %v3173_v30  ;;  %v415_v55 = vld [vmem:[%s3924_s3 + $0x40] sm:$0xff] }
 0x27b   : > { %v872_v1 = vsel %vm280_vm0, %v852_v52, %v864_v33  ;;  %v878_v50 = vsel %vm280_vm0, %v864_v33, %v852_v52  ;;  %v919_v36 = vsel %vm297_vm2, %v898_v28, %v910_v49  ;;  %v925_v52 = vsel %vm297_vm2, %v910_v49, %v898_v28  ;;  %v3191_v38 = vpop.f32.mrb[14].mxu0  ;;  %v414_v33 = vld [vmem:[%s3924_s3 + $0x38] sm:$0xff] }
 0x27c   : > { %v3182_v60 = vmul.f32 %v878_v50, %v2491_v22  ;;  %v3185_v16 = vmul.f32 %v872_v1, %v2485_v20  ;;  %2003 = vmatprep.subr.bf16.mxu1 %v2002_v25  ;;  %451 = vperm.xlu1 %2147, %v413_v10   ;;  %3990 = vst [vmem:[#allocation28_spill] sm:$0xff] %v3191_v38 }
 0x27d   : > { %1622 = vperm.xlu0 %2146, %v1594_v51   ;;  %2005 = vmatpush1.bf16.msra.mxu1 %v2004_v8  ;;  %v3209_v51 = vpop.f32.mrb[15].mxu0  ;;  %v3212_v8 = vmul.f32 %v925_v52, %v2509_v39  ;;  %v3215_v1 = vmul.f32 %v919_v36, %v2513_v41 }
 0x27e   : > { %v970_v15 = vpop.permute.xlu1 %969  ;;  %v912_v31 = vpop.permute.xlu0 %911  ;;  %3991 = vst [vmem:[#allocation29_spill] sm:$0xff] %v3209_v51 }
 0x27f   : > { %v920_v28 = vsel %vm297_vm2, %v3104_v24, %v912_v31  ;;  %v926_v10 = vsel %vm297_vm2, %v912_v31, %v3104_v24  ;;  %v3223_v25 = vpop.f32.mrb[16].mxu0  ;;  %v979_v24 = vsel %vm314_vm3, %v3102_v34, %v970_v15  ;;  %v985_v52 = vsel %vm314_vm3, %v970_v15, %v3102_v34 }
 0x280   : > { %v3218_v50 = vmul.f32 %v926_v10, %v2509_v39  ;;  %v3221_v49 = vmul.f32 %v920_v28, %v2513_v41  ;;  %3992 = vst [vmem:[#allocation30_spill] sm:$0xff] %v3223_v25  ;;  %461 = vperm.xlu1 %2147, %v415_v55   ;;  %v3231_v36 = vpop.f32.mrb[17].mxu0  ;;  %v417_v28 = vld [vmem:[%s3924_s3 + $0x50] sm:$0xff]  ;;  %v416_v25 = vld [vmem:[%s3924_s3 + $0x48] sm:$0xff]  ;;  %v993_v38 = vmul.f32 %v985_v52, %v2517_v42 }
 0x281   : > { %456 = vperm.xlu0 %2146, %v414_v33   ;;  %3993 = vst [vmem:[#allocation31_spill] sm:$0xff] %v3231_v36  ;;  %v3252_v36 = vpop.f32.mrb[18].mxu0  ;;  %v994_v51 = vmul.f32 %v979_v24, %v2520_v43  ;;  %v418_v24 = vld [vmem:[%s3924_s3 + $0x58] sm:$0xff] }
 0x282   : > { %v1318_v31 = vpop.permute.xlu1 %1317  ;;  %v972_v10 = vpop.permute.xlu0 %971  ;;  %3994 = vst [vmem:[#allocation32_spill] sm:$0xff] %v3252_v36 }
 0x283   : > { %v1327_v15 = vsel %vm348_vm5, %v3110_v0, %v1318_v31  ;;  %v980_v55 = vsel %vm314_vm3, %v3112_v2, %v972_v10  ;;  %v986_v33 = vsel %vm314_vm3, %v972_v10, %v3112_v2  ;;  %v3258_v62 = vpop.f32.mrb[19].mxu0  ;;  %v1333_v48 = vsel %vm348_vm5, %v1318_v31, %v3110_v0 }
 0x284   : > { %v995_v34 = vmul.f32 %v986_v33, %v2517_v42  ;;  %v996_v30 = vmul.f32 %v980_v55, %v2520_v43  ;;  %3995 = vst [vmem:[#allocation33_spill] sm:$0xff] %v3258_v62  ;;  %471 = vperm.xlu1 %2147, %v417_v28   ;;  %v3263_v40 = vpop.f32.mrb[20].mxu0 }
 0x285   : > { %466 = vperm.xlu0 %2146, %v416_v25   ;;  %3996 = vst [vmem:[#allocation34_spill] sm:$0xff] %v3263_v40  ;;  %v3280_v31 = vpop.f32.mrb[21].mxu0 }
 0x286   : > { %v1968_v2 = vpack.c.bf16 %v995_v34, %v993_v38  ;;  %v1366_v10 = vpop.permute.xlu1 %1365  ;;  %v1320_v36 = vpop.permute.xlu0 %1319  ;;  %v1966_v52 = vpack.c.bf16 %v996_v30, %v994_v51  ;;  %3997 = vst [vmem:[#allocation35_spill] sm:$0xff] %v3280_v31  ;;  %v3283_v30 = vmul.f32 %v1327_v15, %v2553_v9  ;;  %v3286_v51 = vmul.f32 %v1333_v48, %v2557_v13 }
 0x287   : > { %v1375_v55 = vsel %vm365_vm6, %v3122_v11, %v1366_v10  ;;  %v1381_v0 = vsel %vm365_vm6, %v1366_v10, %v3122_v11  ;;  %v1328_v25 = vsel %vm348_vm5, %v3124_v59, %v1320_v36  ;;  %v1334_v38 = vsel %vm348_vm5, %v1320_v36, %v3124_v59  ;;  %v3294_v34 = vpop.f32.mrb[22].mxu0 }
 0x288   : > { %v3289_v28 = vmul.f32 %v1328_v25, %v2553_v9  ;;  %v3292_v11 = vmul.f32 %v1334_v38, %v2557_v13  ;;  %1967 = vmatprep.subr.bf16.mxu0 %v1966_v52  ;;  %3998 = vst [vmem:[#allocation36_spill] sm:$0xff] %v3294_v34  ;;  %v3296_v59 = vpop.f32.mrb[23].mxu0 }
 0x289   : > { %476 = vperm.xlu0 %2146, %v418_v24   ;;  %1969 = vmatpush1.bf16.msra.mxu0 %v1968_v2  ;;  %3999 = vst [vmem:[#allocation37_spill] sm:$0xff] %v3296_v59  ;;  %v3309_v2 = vmul.f32 %v1375_v55, %v2561_v14  ;;  %v3312_v24 = vmul.f32 %v1381_v0, %v2564_v17 }
 0x28a   : > { %v806_v15 = vpop.permute.xlu1 %805  ;;  %v1368_v33 = vpop.permute.xlu0 %1367 }
 0x28b   : > { %v1376_v10 = vsel %vm365_vm6, %v3131_v29, %v1368_v33  ;;  %v1382_v52 = vsel %vm365_vm6, %v1368_v33, %v3131_v29  ;;  %4000 = vst [vmem:[#allocation38_spill] sm:$0xff] %v3309_v2  ;;  %4001 = vst [vmem:[#allocation39_spill] sm:$0xff] %v3312_v24 }
 0x28c   : > { %v3315_v25 = vmul.f32 %v1376_v10, %v2561_v14  ;;  %v3318_v38 = vmul.f32 %v1382_v52, %v2564_v17 }
 0x28e   : > { %4002 = vst [vmem:[#allocation40_spill] sm:$0xff] %v3315_v25  ;;  %4003 = vst [vmem:[#allocation41_spill] sm:$0xff] %v3318_v38  ;;  %v854_v48 = vpop.permute.xlu1 %853  ;;  %v808_v59 = vpop.permute.xlu0 %807 }
 0x292   : > { %v902_v33 = vpop.permute.xlu1 %901  ;;  %v856_v55 = vpop.permute.xlu0 %855 }
 0x296   : > { %v3324_v34 = vpop.permute.xlu1 %961  ;;  %v904_v0 = vpop.permute.xlu0 %903 }
 0x29a   : > { %v3326_v31 = vpop.permute.xlu1 %1309  ;;  %v3328_v10 = vpop.permute.xlu0 %963 }
 0x29e   : > { %v3330_v40 = vpop.permute.xlu1 %1357  ;;  %v3332_v52 = vpop.permute.xlu0 %1311 }
 0x29f   : > { %4004 = vst [vmem:[#allocation42_spill] sm:$0xff] %v3330_v40 }
 0x2a2   : > { %v818_v62 = vpop.permute.xlu1 %817  ;;  %v3334_v36 = vpop.permute.xlu0 %1359 }
 0x2a3   : > { %4005 = vst [vmem:[#allocation43_spill] sm:$0xff] %v3334_v36  ;;  %v825_v2 = vsel %vm263_vm1, %v806_v15, %v818_v62  ;;  %v831_v29 = vsel %vm263_vm1, %v818_v62, %v806_v15 }
 0x2a4   : > { %v841_v14 = vmul.f32 %v831_v29, %v2488_v21  ;;  %v842_v37 = vmul.f32 %v825_v2, %v2482_v19  ;;  %v4013_v29 = vpack.c.bf16 %v3221_v49, %v3215_v1  ;;  %v4014_v49 = vpack.c.bf16 %v3218_v50, %v3212_v8 }
 0x2a5   : > { %v4015_v50 = vpack.c.bf16 %v3026_v4, %v3020_v18 }
 0x2a6   : > { %v3340_v25 = vpop.permute.xlu1 %1397  ;;  %v820_v24 = vpop.permute.xlu0 %819 }
 0x2a7   : > { %4006 = vst [vmem:[#allocation44_spill] sm:$0xff] %v3340_v25  ;;  %v826_v38 = vsel %vm263_vm1, %v808_v59, %v820_v24  ;;  %v832_v17 = vsel %vm263_vm1, %v820_v24, %v808_v59 }
 0x2a8   : > { %v843_v36 = vmul.f32 %v832_v17, %v2488_v21  ;;  %v844_v35 = vmul.f32 %v826_v38, %v2482_v19  ;;  %v4008_v21 = vpack.c.bf16 %v2933_v58, %v2922_v56  ;;  %v4009_v17 = vpack.c.bf16 %v3185_v16, %v3179_v5 }
 0x2a9   : > { %v4010_v58 = vpack.c.bf16 %v3182_v60, %v3176_v61  ;;  %v4011_v38 = vpack.c.bf16 %v2967_v6, %v2961_v46 }
 0x2aa   : > { %v866_v44 = vpop.permute.xlu1 %865  ;;  %v3350_v40 = vpop.permute.xlu0 %1399  ;;  %v2006_v62 = vpack.c.bf16 %v844_v35, %v842_v37  ;;  %v2008_v15 = vpack.c.bf16 %v843_v36, %v841_v14 }
 0x2ab   : > { %v873_v2 = vsel %vm280_vm0, %v854_v48, %v866_v44  ;;  %v879_v19 = vsel %vm280_vm0, %v866_v44, %v854_v48 }
 0x2ac   : > { %2007 = vmatprep.subr.bf16.mxu1 %v2006_v62  ;;  %v889_v7 = vmul.f32 %v879_v19, %v2491_v22  ;;  %v890_v35 = vmul.f32 %v873_v2, %v2485_v20 }
 0x2ad   : > { %2009 = vmatpush1.bf16.msra.mxu1 %v2008_v15 }
 0x2ae   : > { %v914_v25 = vpop.permute.xlu1 %913  ;;  %2011 = vmatprep.subr.bf16.mxu1 %v4007_v32  ;;  %v3355_v59 = vpop.permute.xlu0 %1411 }
 0x2af   : > { %v921_v60 = vsel %vm297_vm2, %v902_v33, %v914_v25  ;;  %v927_v61 = vsel %vm297_vm2, %v914_v25, %v902_v33 }
 0x2b0   : > { %v938_v62 = vmul.f32 %v921_v60, %v2513_v41 }
 0x2b1   : > { %2013 = vmatpush1.bf16.msra.mxu1 %v4008_v21 }
 0x2b2   : > { %v974_v14 = vpop.permute.xlu1 %973  ;;  %2015 = vmatprep.subr.bf16.mxu1 %v4009_v17  ;;  %v868_v37 = vpop.permute.xlu0 %867  ;;  %v944_v17 = vld [vmem:[%s3925_s4 + $0x18] sm:$0xff] }
 0x2b3   : > { %v874_v32 = vsel %vm280_vm0, %v856_v55, %v868_v37  ;;  %v880_v27 = vsel %vm280_vm0, %v868_v37, %v856_v55 }
 0x2b4   : > { %v891_v44 = vmul.f32 %v880_v27, %v2491_v22  ;;  %v892_v56 = vmul.f32 %v874_v32, %v2485_v20  ;;  %v4012_v20 = vpack.c.bf16 %v2964_v47, %v2958_v63  ;;  %v937_v47 = vmul.f32 %v927_v61, %v2509_v39  ;;  %v4020_v61 = vld [vmem:[#allocation42_spill] sm:$0xff] }
 0x2b5   : > { %2017 = vmatpush1.bf16.msra.mxu1 %v4010_v58 }
 0x2b6   : > { %v1322_v5 = vpop.permute.xlu1 %1321  ;;  %v3378_v16 = vpop.permute.xlu0 %1007  ;;  %v2018_v36 = vpack.c.bf16 %v892_v56, %v890_v35  ;;  %v2020_v48 = vpack.c.bf16 %v891_v44, %v889_v7  ;;  %v4016_v35 = vpack.c.bf16 %v3023_v57, %v3017_v54 }
 0x2b7   : > { %v1329_v18 = vsel %vm348_vm5, %v3326_v31, %v1322_v5  ;;  %v1335_v7 = vsel %vm348_vm5, %v1322_v5, %v3326_v31  ;;  %v1974_v5 = vpack.c.bf16 %v2728_v45, %v2721_v53 }
 0x2b8   : > { %2019 = vmatprep.subr.bf16.mxu1 %v2018_v36  ;;  %v1345_v31 = vmul.f32 %v1329_v18, %v2553_v9 }
 0x2b9   : > { %2021 = vmatpush1.bf16.msra.mxu1 %v2020_v48 }
 0x2ba   : > { %v3380_v24 = vpop.permute.xlu1 %1369  ;;  %2023 = vmatprep.subr.bf16.mxu1 %v4011_v38  ;;  %v3385_v22 = vpop.permute.xlu0 %1019  ;;  %v4018_v38 = vpack.c.bf16 %v3289_v28, %v3283_v30  ;;  %v945_v30 = vld [vmem:[%s3925_s4 + $0x20] sm:$0xff]  ;;  %v948_v28 = vld [vmem:[%s3925_s4 + $0x38] sm:$0xff] }
 0x2bd   : > { %2025 = vmatpush1.bf16.msra.mxu1 %v4012_v20 }
 0x2be   : > { %2027 = vmatprep.subr.bf16.mxu1 %v4013_v29  ;;  %v3397_v55 = vpop.permute.xlu1 %1409  ;;  %v916_v46 = vpop.permute.xlu0 %915  ;;  %v1377_v29 = vsel %vm365_vm6, %v4020_v61, %v3380_v24 }
 0x2bf   : > { %v922_v6 = vsel %vm297_vm2, %v904_v0, %v916_v46  ;;  %v928_v63 = vsel %vm297_vm2, %v916_v46, %v904_v0  ;;  %v987_v0 = vsel %vm314_vm3, %v974_v14, %v3324_v34  ;;  %v4022_v46 = vld [vmem:[#allocation19_spill] sm:$0xff] }
 0x2c0   : > { %v939_v15 = vmul.f32 %v928_v63, %v2509_v39  ;;  %v940_v25 = vmul.f32 %v922_v6, %v2513_v41  ;;  %v981_v39 = vsel %vm314_vm3, %v3324_v34, %v974_v14  ;;  %v941_v41 = vld [vmem:[%s3925_s4] sm:$0xff]  ;;  %v997_v37 = vmul.f32 %v987_v0, %v2517_v42 }
 0x2c1   : > { %2029 = vmatpush1.bf16.msra.mxu1 %v4014_v49  ;;  %v998_v32 = vmul.f32 %v981_v39, %v2520_v43  ;;  %v1422_v0 = vsel %vm382_vm7, %v3350_v40, %v3355_v59  ;;  %v1428_v39 = vsel %vm382_vm7, %v3355_v59, %v3350_v40  ;;  %v1028_v40 = vsel %vm331_vm4, %v3378_v16, %v3385_v22  ;;  %v4033_v59 = vld [vmem:[#allocation20_spill] sm:$0xff] }
 0x2c2   : > { %v3410_v1 = vpop.permute.xlu1 %1005  ;;  %v3412_v33 = vpop.permute.xlu0 %1403  ;;  %v2030_v2 = vpack.c.bf16 %v940_v25, %v938_v62  ;;  %v2032_v19 = vpack.c.bf16 %v939_v15, %v937_v47  ;;  %v4024_v47 = vld [vmem:[#allocation44_spill] sm:$0xff]  ;;  %v4025_v15 = vld [vmem:[#allocation11_spill] sm:$0xff] }
 0x2c3   : > { %v1427_v62 = vsel %vm382_vm7, %v3397_v55, %v4024_v47  ;;  %v4026_v25 = vld [vmem:[#allocation12_spill] sm:$0xff] }
 0x2c4   : > { %2031 = vmatprep.subr.bf16.mxu1 %v2030_v2  ;;  %v1980_v49 = vpack.c.bf16 %v4026_v25, %v4025_v15  ;;  %v4027_v2 = vld [vmem:[#allocation14_spill] sm:$0xff] }
 0x2c5   : > { %2033 = vmatpush1.bf16.msra.mxu1 %v2032_v19  ;;  %v4028_v19 = vld [vmem:[#allocation15_spill] sm:$0xff] }
 0x2c6   : > { %v3423_v8 = vpop.permute.xlu1 %1017  ;;  %2035 = vmatprep.subr.bf16.mxu1 %v4015_v50  ;;  %v4029_v50 = vld [vmem:[#allocation16_spill] sm:$0xff] }
 0x2c7   : > { %v976_v21 = vpop.permute.xlu0 %975 }
 0x2c8   : > { %v982_v34 = vsel %vm314_vm3, %v3328_v10, %v976_v21  ;;  %v988_v14 = vsel %vm314_vm3, %v976_v21, %v3328_v10  ;;  %1265 = vmatmul.mubr.f32.vlgmr.msra.gmra.mrb[0].mxu1 %v941_v41  ;;  %v943_v10 = vld [vmem:[%s3925_s4 + $0x10] sm:$0xff]  ;;  %v1033_v41 = vsel %vm331_vm4, %v3423_v8, %v3410_v1  ;;  %v4030_v21 = vld [vmem:[#allocation17_spill] sm:$0xff] }
 0x2c9   : > { %v999_v4 = vmul.f32 %v988_v14, %v2517_v42  ;;  %v1000_v27 = vmul.f32 %v982_v34, %v2520_v43  ;;  %2037 = vmatpush1.bf16.msra.mxu1 %v4016_v35  ;;  %1918 = vmatprep.mubr.msk.f32.mxu1 %vm1062_vm9, %v944_v17  ;;  %v4017_v42 = vpack.c.bf16 %v3292_v11, %v3286_v51  ;;  %v946_v51 = vld [vmem:[%s3925_s4 + $0x28] sm:$0xff]  ;;  %v4031_v34 = vld [vmem:[#allocation7_spill] sm:$0xff] }
 0x2ca   : > { %v3454_v56 = vpop.permute.xlu1 %1401  ;;  %v1346_v11 = vmul.f32 %v1335_v7, %v2557_v13  ;;  %v1982_v17 = vpack.c.bf16 %v4030_v21, %v4029_v50  ;;  %v1393_v14 = vmul.f32 %v1377_v29, %v4031_v34  ;;  %v950_v7 = vld [vmem:[%s3925_s4 + $0x48] sm:$0xff]  ;;  %v1034_v35 = vsel %vm331_vm4, %v3385_v22, %v3378_v16  ;;  %v951_v21 = vld [vmem:[%s3925_s4 + $0x50] sm:$0xff] }
 0x2cb   : > { %v1972_v44 = vpack.c.bf16 %v999_v4, %v997_v37  ;;  %2039 = vmatprep.subr.bf16.mxu1 %v4017_v42  ;;  %v1324_v43 = vpop.permute.xlu0 %1323  ;;  %v1970_v58 = vpack.c.bf16 %v1000_v27, %v998_v32  ;;  %v947_v37 = vld [vmem:[%s3925_s4 + $0x30] sm:$0xff]  ;;  %v4032_v32 = vld [vmem:[#allocation8_spill] sm:$0xff]  ;;  %v4034_v4 = vld [vmem:[#allocation18_spill] sm:$0xff] }
 0x2cc   : > { %v1330_v54 = vsel %vm348_vm5, %v3332_v52, %v1324_v43  ;;  %v1336_v57 = vsel %vm348_vm5, %v1324_v43, %v3332_v52  ;;  %1271 = vmatmul.mubr.f32.gmra.mrb[2].mxu1 %v943_v10  ;;  %v4035_v27 = vpack.c.bf16 %v4033_v59, %v4034_v4  ;;  %v1421_v10 = vsel %vm382_vm7, %v4024_v47, %v3397_v55  ;;  %v4040_v16 = vld [vmem:[#allocation6_spill] sm:$0xff]  ;;  %v4047_v47 = vld [vmem:[#allocation25_spill] sm:$0xff] }
 0x2cd   : > { %v1347_v36 = vmul.f32 %v1330_v54, %v2553_v9  ;;  %v1348_v48 = vmul.f32 %v1336_v57, %v2557_v13  ;;  %1971 = vmatprep.subr.bf16.mxu0 %v1970_v58  ;;  %2041 = vmatpush1.bf16.msra.mxu1 %v4018_v38  ;;  %v1976_v9 = vpack.c.bf16 %v2682_v23, %v2671_v3  ;;  %v4019_v13 = vld [vmem:[#allocation13_spill] sm:$0xff] }
 0x2ce   : > { %1973 = vmatpush1.bf16.msra.mxu0 %v1972_v44  ;;  %v3477_v20 = vpop.permute.xlu1 %1413  ;;  %1919 = vmatprep.mubr.msk.f32.mxu1 %vm1062_vm9, %v946_v51  ;;  %v1978_v60 = vpack.c.bf16 %v4019_v13, %v2801_v26  ;;  %v1383_v3 = vsel %vm365_vm6, %v3380_v24, %v4020_v61  ;;  %v4021_v26 = vld [vmem:[#allocation21_spill] sm:$0xff]  ;;  %v1984_v24 = vpack.c.bf16 %v4028_v19, %v4027_v2  ;;  %v4041_v51 = vld [vmem:[#allocation43_spill] sm:$0xff]  ;;  %v952_v61 = vld [vmem:[%s3925_s4 + $0x58] sm:$0xff] }
 0x2cf   : > { %v2044_v52 = vpack.c.bf16 %v1347_v36, %v1345_v31  ;;  %1975 = vmatprep.subr.bf16.mxu0 %v1974_v5  ;;  %v3479_v53 = vpop.permute.xlu0 %1415  ;;  %v2042_v45 = vpack.c.bf16 %v1348_v48, %v1346_v11  ;;  %v4023_v6 = vpack.c.bf16 %v4021_v26, %v4022_v46  ;;  %v1394_v18 = vmul.f32 %v1383_v3, %v4032_v32  ;;  %v4036_v44 = vld [vmem:[#allocation9_spill] sm:$0xff]  ;;  %v4038_v31 = vld [vmem:[#allocation39_spill] sm:$0xff] }
 0x2d0   : > { %1277 = vmatmul.mubr.f32.gmra.mrb[4].mxu1 %v945_v30  ;;  %v1434_v42 = vmul.f32 %v1427_v62, %v4036_v44  ;;  %v4037_v58 = vld [vmem:[#allocation41_spill] sm:$0xff]  ;;  %v1027_v5 = vsel %vm331_vm4, %v3410_v1, %v3423_v8  ;;  %v1042_v22 = vmul.f32 %v1033_v41, %v4040_v16  ;;  %v1429_v36 = vsel %vm382_vm7, %v3477_v20, %v3454_v56  ;;  %v4044_v30 = vld [vmem:[#allocation38_spill] sm:$0xff]  ;;  %v4048_v62 = vld [vmem:[#allocation23_spill] sm:$0xff] }
 0x2d1   : > { %2043 = vmatprep.subr.bf16.mxu1 %v2042_v45  ;;  %1920 = vmatprep.mubr.msk.f32.mxu1 %vm1062_vm9, %v948_v28  ;;  %v4039_v54 = vpack.c.bf16 %v4037_v58, %v4038_v31  ;;  %v1430_v1 = vsel %vm382_vm7, %v3479_v53, %v3412_v33  ;;  %v949_v38 = vld [vmem:[%s3925_s4 + $0x40] sm:$0xff]  ;;  %v1044_v13 = vmul.f32 %v1034_v35, %v4040_v16 }
 0x2d2   : > { %1977 = vmatpush1.bf16.msra.mxu0 %v1976_v9  ;;  %2045 = vmatpush1.bf16.msra.mxu1 %v2044_v52  ;;  %v3500_v23 = vpop.permute.xlu1 %1009  ;;  %v4042_v52 = vld [vmem:[#allocation10_spill] sm:$0xff]  ;;  %v1436_v9 = vmul.f32 %v1428_v39, %v4036_v44  ;;  %v4046_v3 = vld [vmem:[#allocation5_spill] sm:$0xff]  ;;  %v4049_v15 = vpack.c.bf16 %v4047_v47, %v4048_v62  ;;  %v1423_v19 = vsel %vm382_vm7, %v3454_v56, %v3477_v20  ;;  %v1909_v62 = vld [vmem:[%s3925_s4 + $0xb0] sm:$0xff] }
 0x2d3   : > { %1979 = vmatprep.subr.bf16.mxu0 %v1978_v60  ;;  %2047 = vmatprep.subr.bf16.mxu1 %v4023_v6  ;;  %v3505_v63 = vpop.permute.xlu0 %1011  ;;  %v1435_v45 = vmul.f32 %v1422_v0, %v4042_v52  ;;  %v4043_v60 = vld [vmem:[#allocation40_spill] sm:$0xff]  ;;  %v1433_v29 = vmul.f32 %v1421_v10, %v4042_v52  ;;  %v1041_v26 = vmul.f32 %v1027_v5, %v4046_v3  ;;  %v1931_v47 = vld [vmem:[%s3925_s4 + $0x100] sm:$0xff] }
 0x2d4   : > { %1283 = vmatmul.mubr.f32.gmra.mrb[6].mxu1 %v947_v37  ;;  %v4045_v28 = vpack.c.bf16 %v4043_v60, %v4044_v30  ;;  %v1043_v2 = vmul.f32 %v1028_v40, %v4046_v3  ;;  %v1440_v0 = vmul.f32 %v1430_v1, %v4036_v44  ;;  %v1424_v39 = vsel %vm382_vm7, %v3412_v33, %v3479_v53  ;;  %v4051_v37 = vld [vmem:[#allocation22_spill] sm:$0xff]  ;;  %v1906_v60 = vld [vmem:[%s3925_s4 + $0x98] sm:$0xff]  ;;  %v1927_v30 = vld [vmem:[%s3925_s4 + $0xe0] sm:$0xff] }
 0x2d5   : > { %1921 = vmatprep.mubr.msk.f32.mxu1 %vm1062_vm9, %v950_v7  ;;  %v1990_v41 = vpack.c.bf16 %v1044_v13, %v1042_v22  ;;  %v2058_v50 = vpack.c.bf16 %v1436_v9, %v1434_v42  ;;  %v1924_v53 = vld [vmem:[%s3925_s4 + $0xc8] sm:$0xff]  ;;  %v1439_v59 = vmul.f32 %v1424_v39, %v4042_v52  ;;  %v1903_v9 = vld [vmem:[%s3925_s4 + $0x80] sm:$0xff] }
 0x2d6   : > { %1981 = vmatpush1.bf16.msra.mxu0 %v1980_v49  ;;  %2049 = vmatpush1.bf16.msra.mxu1 %v4035_v27  ;;  %v1022_v43 = vpop.permute.xlu1 %1021  ;;  %v1928_v13 = vld [vmem:[%s3925_s4 + $0xe8] sm:$0xff] }
 0x2d7   : > { %1983 = vmatprep.subr.bf16.mxu0 %v1982_v17  ;;  %2051 = vmatprep.subr.bf16.mxu1 %v4039_v54  ;;  %v1372_v57 = vpop.permute.xlu0 %1371  ;;  %v1029_v56 = vsel %vm331_vm4, %v3500_v23, %v1022_v43  ;;  %v1035_v20 = vsel %vm331_vm4, %v1022_v43, %v3500_v23  ;;  %v4050_v17 = vld [vmem:[#allocation24_spill] sm:$0xff] }
 0x2d8   : > { %v1378_v55 = vsel %vm365_vm6, %v4041_v51, %v1372_v57  ;;  %v1384_v11 = vsel %vm365_vm6, %v1372_v57, %v4041_v51  ;;  %1289 = vmatmul.mubr.f32.gmra.mrb[8].mxu1 %v949_v38  ;;  %v4052_v33 = vpack.c.bf16 %v4050_v17, %v4051_v37  ;;  %v1045_v7 = vmul.f32 %v1029_v56, %v4046_v3  ;;  %v1926_v38 = vld [vmem:[%s3925_s4 + $0xd8] sm:$0xff] }
 0x2d9   : > { %v1395_v8 = vmul.f32 %v1378_v55, %v4031_v34  ;;  %v1396_v48 = vmul.f32 %v1384_v11, %v4032_v32  ;;  %1922 = vmatprep.mubr.msk.f32.mxu1 %vm1062_vm9, %v952_v61  ;;  %v2060_v34 = vpack.c.bf16 %v1435_v45, %v1433_v29  ;;  %v1437_v32 = vmul.f32 %v1423_v19, %v4042_v52  ;;  %v1925_v45 = vld [vmem:[%s3925_s4 + $0xd0] sm:$0xff]  ;;  %v1930_v61 = vld [vmem:[%s3925_s4 + $0xf8] sm:$0xff]  ;;  %v1908_v29 = vld [vmem:[%s3925_s4 + $0xa8] sm:$0xff] }
 0x2da   : > { %1985 = vmatpush1.bf16.msra.mxu0 %v1984_v24  ;;  %2053 = vmatpush1.bf16.msra.mxu1 %v4045_v28  ;;  %v1406_v6 = vpop.permute.xlu1 %1405  ;;  %v1438_v24 = vmul.f32 %v1429_v36, %v4036_v44  ;;  %v1046_v35 = vmul.f32 %v1035_v20, %v4040_v16  ;;  %v1899_v36 = vld [vmem:[%s3925_s4 + $0x60] sm:$0xff]  ;;  %v1905_v28 = vld [vmem:[%s3925_s4 + $0x90] sm:$0xff] }
 0x2db   : > { %v2056_v46 = vpack.c.bf16 %v1395_v8, %v1393_v14  ;;  %1987 = vmatprep.subr.bf16.mxu0 %v4049_v15  ;;  %v1408_v25 = vpop.permute.xlu0 %1407  ;;  %v2054_v49 = vpack.c.bf16 %v1396_v48, %v1394_v18  ;;  %v1992_v14 = vpack.c.bf16 %v1043_v2, %v1041_v26  ;;  %v2064_v57 = vpack.c.bf16 %v1439_v59, %v1437_v32  ;;  %v1901_v48 = vld [vmem:[%s3925_s4 + $0x70] sm:$0xff]  ;;  %v1907_v26 = vld [vmem:[%s3925_s4 + $0xa0] sm:$0xff]  ;;  %v1934_v15 = vld [vmem:[%s3925_s4 + $0x118] sm:$0xff] }
 0x2dc   : > { %v2062_v27 = vpack.c.bf16 %v1440_v0, %v1438_v24  ;;  %1295 = vmatmul.mubr.f32.gmra.mrb[10].mxu1 %v951_v21 }
 0x2dd   : > { %2055 = vmatprep.subr.bf16.mxu1 %v2054_v49  ;;  %1935 = vmatprep.mubr.msk.f32.mxu1 %vm1062_vm9, %v1924_v53 }
 0x2de   : > { %1989 = vmatpush1.bf16.msra.mxu0 %v4052_v33  ;;  %2057 = vmatpush1.bf16.msra.mxu1 %v2056_v46  ;;  %v1418_v18 = vpop.permute.xlu1 %1417  ;;  %v1932_v46 = vld [vmem:[%s3925_s4 + $0x108] sm:$0xff] }
 0x2df   : > { %1991 = vmatprep.subr.bf16.mxu0 %v1990_v41  ;;  %2059 = vmatprep.subr.bf16.mxu1 %v2058_v50  ;;  %v1024_v40 = vpop.permute.xlu0 %1023  ;;  %v1425_v43 = vsel %vm382_vm7, %v1406_v6, %v1418_v18  ;;  %v1431_v58 = vsel %vm382_vm7, %v1418_v18, %v1406_v6  ;;  %v1910_v6 = vld [vmem:[%s3925_s4 + $0xb8] sm:$0xff] }
 0x2e0   : > { %v1030_v23 = vsel %vm331_vm4, %v3505_v63, %v1024_v40  ;;  %v1036_v4 = vsel %vm331_vm4, %v1024_v40, %v3505_v63  ;;  %v1441_v22 = vmul.f32 %v1425_v43, %v4042_v52  ;;  %v1442_v51 = vmul.f32 %v1431_v58, %v4036_v44 }
 0x2e1   : > { %v1047_v10 = vmul.f32 %v1030_v23, %v4046_v3  ;;  %v1048_v42 = vmul.f32 %v1036_v4, %v4040_v16  ;;  %v1929_v3 = vld [vmem:[%s3925_s4 + $0xf0] sm:$0xff] }
 0x2e2   : > { %1993 = vmatpush1.bf16.msra.mxu0 %v1992_v14  ;;  %2061 = vmatpush1.bf16.msra.mxu1 %v2060_v34 }
 0x2e3   : > { %v1996_v63 = vpack.c.bf16 %v1047_v10, %v1045_v7  ;;  %2063 = vmatprep.subr.bf16.mxu1 %v2062_v27  ;;  %v1420_v31 = vpop.permute.xlu0 %1419  ;;  %v1994_v54 = vpack.c.bf16 %v1048_v42, %v1046_v35 }
 0x2e4   : > { %v1426_v5 = vsel %vm382_vm7, %v1408_v25, %v1420_v31  ;;  %v1432_v16 = vsel %vm382_vm7, %v1420_v31, %v1408_v25  ;;  %v1933_v25 = vld [vmem:[%s3925_s4 + $0x110] sm:$0xff] }
 0x2e5   : > { %v1443_v55 = vmul.f32 %v1426_v5, %v4042_v52  ;;  %v1444_v11 = vmul.f32 %v1432_v16, %v4036_v44  ;;  %1995 = vmatprep.subr.bf16.mxu0 %v1994_v54  ;;  %v1923_v44 = vld [vmem:[%s3925_s4 + $0xc0] sm:$0xff]  ;;  %v1904_v52 = vld [vmem:[%s3925_s4 + $0x88] sm:$0xff] }
 0x2e6   : > { %1997 = vmatpush1.bf16.msra.mxu0 %v1996_v63  ;;  %2065 = vmatpush1.bf16.msra.mxu1 %v2064_v57 }
 0x2e7   : > { %v2068_v1 = vpack.c.bf16 %v1443_v55, %v1441_v22  ;;  %v2066_v8 = vpack.c.bf16 %v1444_v11, %v1442_v51 }
 0x2e9   : > { %2067 = vmatprep.subr.bf16.mxu1 %v2066_v8  ;;  %1146 = vmatmul.mubr.f32.vlgmr.msra.gmra.mrb[24].mxu0 %v1899_v36 }
 0x2ea   : > { %2069 = vmatpush1.bf16.msra.mxu1 %v2068_v1  ;;  %1912 = vmatprep.mubr.msk.f32.mxu0 %vm1062_vm9, %v1902_v12 }
 0x2ed   : > { %1541 = vmatmul.mubr.f32.vlgmr.msra.gmra.mrb[0].mxu1 %v1923_v44  ;;  %1152 = vmatmul.mubr.f32.gmra.mrb[26].mxu0 %v1901_v48 }
 0x2ee   : > { %1936 = vmatprep.mubr.msk.f32.mxu1 %vm1062_vm9, %v1926_v38  ;;  %1913 = vmatprep.mubr.msk.f32.mxu0 %vm1062_vm9, %v1904_v52 }
 0x2ef   : > { %v1598_v50 = vpop.permute.xlu1 %1597 }
 0x2f1   : > { %1547 = vmatmul.mubr.f32.gmra.mrb[2].mxu1 %v1925_v45  ;;  %1158 = vmatmul.mubr.f32.gmra.mrb[28].mxu0 %v1903_v9 }
 0x2f2   : > { %1937 = vmatprep.mubr.msk.f32.mxu1 %vm1062_vm9, %v1928_v13  ;;  %1914 = vmatprep.mubr.msk.f32.mxu0 %vm1062_vm9, %v1906_v60 }
 0x2f3   : > { %v1608_v63 = vpop.permute.xlu1 %1607 }
 0x2f4   : > { %v1603_v32 = vpop.permute.xlu0 %1602 }
 0x2f5   : > { %1553 = vmatmul.mubr.f32.gmra.mrb[4].mxu1 %v1927_v30  ;;  %1164 = vmatmul.mubr.f32.gmra.mrb[30].mxu0 %v1905_v28 }
 0x2f6   : > { %1938 = vmatprep.mubr.msk.f32.mxu1 %vm1062_vm9, %v1930_v61  ;;  %1915 = vmatprep.mubr.msk.f32.mxu0 %vm1062_vm9, %v1908_v29 }
 0x2f8   : > { %v1613_v12 = vpop.permute.xlu0 %1612 }
 0x2f9   : > { %1559 = vmatmul.mubr.f32.gmra.mrb[6].mxu1 %v1929_v3  ;;  %1170 = vmatmul.mubr.f32.gmra.mrb[32].mxu0 %v1907_v26  ;;  %v1618_v3 = vpop.permute.xlu1 %1617 }
 0x2fa   : > { %1939 = vmatprep.mubr.msk.f32.mxu1 %vm1062_vm9, %v1932_v46  ;;  %1916 = vmatprep.mubr.msk.f32.mxu0 %vm1062_vm9, %v1910_v6 }
 0x2fd   : > { %1565 = vmatmul.mubr.f32.gmra.mrb[8].mxu1 %v1931_v47  ;;  %1176 = vmatmul.mubr.f32.gmra.mrb[34].mxu0 %v1909_v62 }
 0x2fe   : > { %1940 = vmatprep.mubr.msk.f32.mxu1 %vm1062_vm9, %v1934_v15 }
 0x301   : > { %1571 = vmatmul.mubr.f32.gmra.mrb[10].mxu1 %v1933_v25 }
 0x3bc   : > { %v1147_v49 = vpop.f32.mrb[24].mxu0 }
 0x3bd   : > { %v1149_v2 = vpop.f32.mrb[25].mxu0 }
 0x3c0   : > { %v1542_v19 = vpop.f32.mrb[0].mxu1  ;;  %v1153_v24 = vpop.f32.mrb[26].mxu0 }
 0x3c1   : > { %v2070_v0 = vadd.f32 %v1542_v19, %v1147_v49  ;;  %v1544_v39 = vpop.f32.mrb[1].mxu1  ;;  %v1155_v41 = vpop.f32.mrb[27].mxu0 }
 0x3c2   : > { %v2071_v21 = vadd.f32 %v1544_v39, %v1149_v2 }
 0x3c3   : > { %v3724_v56 = vadd.f32 %v2070_v0, %v1598_v50 }
 0x3c4   : > { %v3726_v20 = vadd.f32 %v2071_v21, %v1598_v50  ;;  %v1548_v17 = vpop.f32.mrb[2].mxu1  ;;  %v1159_v37 = vpop.f32.mrb[28].mxu0 }
 0x3c5   : > { %v1637_v33 = vmin.f32 %v3724_v56, 20.0  ;;  %v2072_v53 = vadd.f32 %v1548_v17, %v1153_v24  ;;  %v1550_v34 = vpop.f32.mrb[3].mxu1  ;;  %v1161_v14 = vpop.f32.mrb[29].mxu0 }
 0x3c6   : > { %v1638_v18 = vmin.f32 %v3726_v20, 20.0  ;;  %v2073_v40 = vadd.f32 %v1550_v34, %v1155_v41  ;;  %v1623_v50 = vpop.permute.xlu0 %1622 }
 0x3c7   : > { %v1649_v59 = vmul.f32 1.442695, %v1637_v33  ;;  %v3730_v23 = vadd.f32 %v2072_v53, %v1603_v32 }
 0x3c8   : > { %v1651_v4 = vmul.f32 1.442695, %v1638_v18  ;;  %v3732_v27 = vadd.f32 %v2073_v40, %v1603_v32  ;;  %v1554_v7 = vpop.f32.mrb[4].mxu1  ;;  %v1165_v35 = vpop.f32.mrb[30].mxu0 }
 0x3c9   : > { %2196 = vpow2.f32 %v1649_v59  ;;  %v1639_v10 = vmin.f32 %v3730_v23, 20.0  ;;  %v2074_v42 = vadd.f32 %v1554_v7, %v1159_v37  ;;  %v1556_v43 = vpop.f32.mrb[5].mxu1  ;;  %v1167_v58 = vpop.f32.mrb[31].mxu0 }
 0x3ca   : > { %2198 = vpow2.f32 %v1651_v4  ;;  %v1640_v31 = vmin.f32 %v3732_v27, 20.0  ;;  %v2075_v54 = vadd.f32 %v1556_v43, %v1161_v14 }
 0x3cb   : > { %v1653_v57 = vmul.f32 1.442695, %v1639_v10  ;;  %v3736_v5 = vadd.f32 %v2074_v42, %v1608_v63 }
 0x3cc   : > { %v1655_v16 = vmul.f32 1.442695, %v1640_v31  ;;  %v3738_v22 = vadd.f32 %v2075_v54, %v1608_v63  ;;  %v1560_v51 = vpop.f32.mrb[6].mxu1  ;;  %v1171_v55 = vpop.f32.mrb[32].mxu0 }
 0x3cd   : > { %2200 = vpow2.f32 %v1653_v57  ;;  %v1641_v11 = vmin.f32 %v3736_v5, 20.0  ;;  %v2076_v36 = vadd.f32 %v1560_v51, %v1165_v35  ;;  %v1562_v1 = vpop.f32.mrb[7].mxu1  ;;  %v1173_v8 = vpop.f32.mrb[33].mxu0 }
 0x3ce   : > { %2202 = vpow2.f32 %v1655_v16  ;;  %v1642_v44 = vmin.f32 %v3738_v22, 20.0  ;;  %v2077_v48 = vadd.f32 %v1562_v1, %v1167_v58 }
 0x3cf   : > { %v1657_v38 = vmul.f32 1.442695, %v1641_v11  ;;  %v3742_v52 = vadd.f32 %v2076_v36, %v1613_v12 }
 0x3d0   : > { %v1659_v45 = vmul.f32 1.442695, %v1642_v44  ;;  %v3744_v9 = vadd.f32 %v2077_v48, %v1613_v12  ;;  %v1566_v13 = vpop.f32.mrb[8].mxu1  ;;  %v1177_v60 = vpop.f32.mrb[34].mxu0 }
 0x3d1   : > { %2204 = vpow2.f32 %v1657_v38  ;;  %v1643_v30 = vmin.f32 %v3742_v52, 20.0  ;;  %v2078_v28 = vadd.f32 %v1566_v13, %v1171_v55  ;;  %v1568_v61 = vpop.f32.mrb[9].mxu1  ;;  %v1179_v29 = vpop.f32.mrb[35].mxu0 }
 0x3d2   : > { %2206 = vpow2.f32 %v1659_v45  ;;  %v1644_v26 = vmin.f32 %v3744_v9, 20.0  ;;  %v2079_v46 = vadd.f32 %v1568_v61, %v1173_v8 }
 0x3d3   : > { %v2197_v6 = vpop.eup %2196  ;;  %v1661_v47 = vmul.f32 1.442695, %v1643_v30  ;;  %v3748_v62 = vadd.f32 %v2078_v28, %v1618_v3  ;;  %v452_v30 = vpop.permute.xlu1 %451 }
 0x3d4   : > { %v2199_v15 = vpop.eup %2198  ;;  %v1673_v25 = vadd.f32 2.0, %v2197_v6  ;;  %v1663_v49 = vmul.f32 1.442695, %v1644_v26  ;;  %v3750_v2 = vadd.f32 %v2079_v46, %v1618_v3  ;;  %v1572_v19 = vpop.f32.mrb[10].mxu1 }
 0x3d5   : > { %v1674_v24 = vadd.f32 2.0, %v2199_v15  ;;  %2208 = vpow2.f32 %v1661_v47  ;;  %v1645_v0 = vmin.f32 %v3748_v62, 20.0  ;;  %v2080_v39 = vadd.f32 %v1572_v19, %v1177_v60  ;;  %v1574_v41 = vpop.f32.mrb[11].mxu1  ;;  %v457_v46 = vpop.permute.xlu0 %456 }
 0x3d6   : > { %v3753_v21 = vmul.f32 %v2197_v6, %v1673_v25  ;;  %2210 = vpow2.f32 %v1663_v49  ;;  %v1646_v17 = vmin.f32 %v3750_v2, 20.0  ;;  %v2081_v37 = vadd.f32 %v1574_v41, %v1179_v29  ;;  %v4053_v25 = vld [vmem:[#allocation26_spill] sm:$0xff] }
 0x3d7   : > { %v2201_v33 = vpop.eup %2200  ;;  %v3756_v53 = vmul.f32 %v2199_v15, %v1674_v24  ;;  %v1665_v34 = vmul.f32 1.442695, %v1645_v0  ;;  %v3758_v14 = vadd.f32 %v2080_v39, %v1623_v50  ;;  %v619_v49 = vadd.f32 %v4053_v25, %v452_v30  ;;  %v4054_v0 = vld [vmem:[#allocation27_spill] sm:$0xff] }
 0x3d8   : > { %v2203_v32 = vpop.eup %2202  ;;  %v1697_v18 = vadd.f32 2.0, %v3753_v21  ;;  %v1675_v40 = vadd.f32 2.0, %v2201_v33  ;;  %v1667_v59 = vmul.f32 1.442695, %v1646_v17  ;;  %v3765_v42 = vadd.f32 %v2081_v37, %v1623_v50  ;;  %v4055_v37 = vld [vmem:[#allocation28_spill] sm:$0xff] }
 0x3d9   : > { %v1698_v4 = vadd.f32 2.0, %v3756_v53  ;;  %v1676_v7 = vadd.f32 2.0, %v2203_v32  ;;  %2212 = vpow2.f32 %v1665_v34  ;;  %v1647_v10 = vmin.f32 %v3758_v14, 20.0  ;;  %v4056_v34 = vld [vmem:[#allocation29_spill] sm:$0xff] }
 0x3da   : > { %2214 = vrcp.f32 %v1697_v18  ;;  %v3762_v35 = vmul.f32 %v2201_v33, %v1675_v40  ;;  %v1648_v11 = vmin.f32 %v3765_v42, 20.0  ;;  %v621_v39 = vadd.f32 %v4054_v0, %v452_v30 }
 0x3db   : > { %v2205_v43 = vpop.eup %2204  ;;  %2216 = vrcp.f32 %v1698_v4  ;;  %v3767_v58 = vmul.f32 %v2203_v32, %v1676_v7  ;;  %v1669_v51 = vmul.f32 1.442695, %v1647_v10  ;;  %v625_v33 = vadd.f32 %v4055_v37, %v457_v46  ;;  %v4057_v37 = vld [vmem:[#allocation30_spill] sm:$0xff] }
 0x3dc   : > { %v2207_v63 = vpop.eup %2206  ;;  %v1699_v31 = vadd.f32 2.0, %v3762_v35  ;;  %v1677_v54 = vadd.f32 2.0, %v2205_v43  ;;  %2218 = vpow2.f32 %v1667_v59  ;;  %v1671_v45 = vmul.f32 1.442695, %v1648_v11 }
 0x3dd   : > { %v1700_v57 = vadd.f32 2.0, %v3767_v58  ;;  %v1678_v16 = vadd.f32 2.0, %v2207_v63  ;;  %v627_v32 = vadd.f32 %v4056_v34, %v457_v46  ;;  %v1757_v7 = vmul.f32 %v3753_v21, %v3724_v56 }
 0x3de   : > { %2220 = vrcp.f32 %v1699_v31  ;;  %v3771_v55 = vmul.f32 %v2205_v43, %v1677_v54 }
 0x3df   : > { %v2209_v36 = vpop.eup %2208  ;;  %2222 = vrcp.f32 %v1700_v57  ;;  %v3774_v1 = vmul.f32 %v2207_v63, %v1678_v16  ;;  %v1758_v16 = vmul.f32 %v3756_v53, %v3726_v20 }
 0x3e0   : > { %v2211_v8 = vpop.eup %2210  ;;  %v1701_v12 = vadd.f32 2.0, %v3771_v55  ;;  %v1679_v44 = vadd.f32 2.0, %v2209_v36  ;;  %2224 = vpow2.f32 %v1669_v51 }
 0x3e1   : > { %v1702_v48 = vadd.f32 2.0, %v3774_v1  ;;  %v1680_v38 = vadd.f32 2.0, %v2211_v8 }
 0x3e2   : > { %2226 = vrcp.f32 %v1701_v12  ;;  %v3778_v13 = vmul.f32 %v2209_v36, %v1679_v44 }
 0x3e3   : > { %v2213_v60 = vpop.eup %2212  ;;  %2228 = vrcp.f32 %v1702_v48  ;;  %v3780_v28 = vmul.f32 %v2211_v8, %v1680_v38  ;;  %v1759_v8 = vmul.f32 %v3762_v35, %v3730_v23  ;;  %v1760_v38 = vmul.f32 %v3767_v58, %v3732_v27 }
 0x3e4   : > { %v2215_v61 = vpop.eup %2214  ;;  %v3783_v29 = vadd.f32 2.0, %v3778_v13  ;;  %v1681_v3 = vadd.f32 2.0, %v2213_v60  ;;  %2230 = vpow2.f32 %v1671_v45  ;;  %v1761_v58 = vmul.f32 %v3771_v55, %v3736_v5 }
 0x3e5   : > { %v2217_v26 = vpop.eup %2216  ;;  %v1721_v6 = vmul.f32 %v2215_v61, %v1697_v18  ;;  %v3787_v47 = vadd.f32 2.0, %v3780_v28 }
 0x3e6   : > { %v2219_v15 = vpop.eup %2218  ;;  %v1722_v19 = vmul.f32 %v2217_v26, %v1698_v4  ;;  %2232 = vrcp.f32 %v3783_v29  ;;  %v3791_v24 = vmul.f32 %v2213_v60, %v1681_v3 }
 0x3e7   : > { %v1733_v41 = vsub.f32 2.0, %v1721_v6  ;;  %2234 = vrcp.f32 %v3787_v47  ;;  %v1682_v50 = vadd.f32 2.0, %v2219_v15  ;;  %v462_v6 = vpop.permute.xlu1 %461 }
 0x3e8   : > { %v2221_v17 = vpop.eup %2220  ;;  %v1734_v18 = vsub.f32 2.0, %v1722_v19  ;;  %v3802_v40 = vadd.f32 2.0, %v3791_v24  ;;  %v631_v34 = vadd.f32 %v4057_v37, %v462_v6 }
 0x3e9   : > { %v2223_v59 = vpop.eup %2222  ;;  %v1745_v4 = vmul.f32 %v2215_v61, %v1733_v41  ;;  %v1723_v10 = vmul.f32 %v2221_v17, %v1699_v31  ;;  %v3806_v43 = vmul.f32 %v2219_v15, %v1682_v50 }
 0x3ea   : > { %v2225_v63 = vpop.eup %2224  ;;  %v1746_v54 = vmul.f32 %v2217_v26, %v1734_v18  ;;  %v1724_v51 = vmul.f32 %v2223_v59, %v1700_v57  ;;  %2236 = vrcp.f32 %v3802_v40 }
 0x3eb   : > { %v1769_v11 = vmul.f32 %v1757_v7, %v1745_v4  ;;  %v1735_v36 = vsub.f32 2.0, %v1723_v10  ;;  %v3814_v44 = vadd.f32 2.0, %v3806_v43  ;;  %v1683_v45 = vadd.f32 2.0, %v2225_v63  ;;  %v467_v7 = vpop.permute.xlu0 %466 }
 0x3ec   : > { %v2227_v56 = vpop.eup %2226  ;;  %v1770_v21 = vmul.f32 %v1758_v16, %v1746_v54  ;;  %v1736_v31 = vsub.f32 2.0, %v1724_v51 }
 0x3ed   : > { %v2229_v20 = vpop.eup %2228  ;;  %v1781_v53 = vadd.f32 %v1769_v11, %v619_v49  ;;  %v1747_v57 = vmul.f32 %v2221_v17, %v1735_v36  ;;  %v1725_v60 = vmul.f32 %v2227_v56, %v1701_v12  ;;  %2238 = vrcp.f32 %v3814_v44 }
 0x3ee   : > { %v2231_v30 = vpop.eup %2230  ;;  %v1782_v61 = vadd.f32 %v1770_v21, %v621_v39  ;;  %v1748_v23 = vmul.f32 %v2223_v59, %v1736_v31  ;;  %v1726_v35 = vmul.f32 %v2229_v20, %v1702_v48  ;;  %v3819_v3 = vmul.f32 %v2225_v63, %v1683_v45  ;;  %v4060_v31 = vld [vmem:[#allocation33_spill] sm:$0xff] }
 0x3ef   : > { %1793 = vst [vmem:[%s3822_s15] sm:$0xff] %v1781_v53  ;;  %v1771_v26 = vmul.f32 %v1759_v8, %v1747_v57  ;;  %v1737_v27 = vsub.f32 2.0, %v1725_v60  ;;  %v1684_v46 = vadd.f32 2.0, %v2231_v30  ;;  %v1762_v48 = vmul.f32 %v3774_v1, %v3738_v22  ;;  %v4059_v8 = vld [vmem:[#allocation32_spill] sm:$0xff]  ;;  %v4061_v60 = vld [vmem:[#allocation34_spill] sm:$0xff] }
 0x3f0   : > { %v2233_v12 = vpop.eup %2232  ;;  %1794 = vst [vmem:[%s3822_s15 + $0x8] sm:$0xff] %v1782_v61  ;;  %v1772_v15 = vmul.f32 %v1760_v38, %v1748_v23  ;;  %v1738_v25 = vsub.f32 2.0, %v1726_v35  ;;  %v1707_v49 = vadd.f32 2.0, %v3819_v3  ;;  %v1764_v11 = vmul.f32 %v3780_v28, %v3744_v9 }
 0x3f1   : > { %v2235_v19 = vpop.eup %2234  ;;  %v1783_v0 = vadd.f32 %v1771_v26, %v625_v33  ;;  %v1749_v39 = vmul.f32 %v2227_v56, %v1737_v27  ;;  %v1727_v41 = vmul.f32 %v2233_v12, %v3783_v29  ;;  %v3832_v50 = vmul.f32 %v2231_v30, %v1684_v46  ;;  %v4058_v33 = vld [vmem:[#allocation31_spill] sm:$0xff] }
 0x3f2   : > { %v1784_v5 = vadd.f32 %v1772_v15, %v627_v32  ;;  %v1750_v55 = vmul.f32 %v2229_v20, %v1738_v25  ;;  %v1728_v17 = vmul.f32 %v2235_v19, %v3787_v47  ;;  %2240 = vrcp.f32 %v1707_v49 }
 0x3f3   : > { %1795 = vst [vmem:[%s3822_s15 + $0x10] sm:$0xff] %v1783_v0  ;;  %v1773_v18 = vmul.f32 %v1761_v58, %v1749_v39  ;;  %v1739_v22 = vsub.f32 2.0, %v1727_v41  ;;  %v1708_v1 = vadd.f32 2.0, %v3832_v50  ;;  %v633_v4 = vadd.f32 %v4058_v33, %v462_v6  ;;  %v4062_v58 = vld [vmem:[#allocation35_spill] sm:$0xff]  ;;  %v477_v6 = vpop.permute.xlu0 %476 }
 0x3f4   : > { %v2237_v59 = vpop.eup %2236  ;;  %1796 = vst [vmem:[%s3822_s15 + $0x18] sm:$0xff] %v1784_v5  ;;  %v1774_v29 = vmul.f32 %v1762_v48, %v1750_v55  ;;  %v1763_v32 = vmul.f32 %v3778_v13, %v3742_v52  ;;  %v1740_v47 = vsub.f32 2.0, %v1728_v17  ;;  %v637_v56 = vadd.f32 %v4059_v8, %v467_v7  ;;  %v472_v13 = vpop.permute.xlu1 %471  ;;  %v4064_v55 = vld [vmem:[#allocation37_spill] sm:$0xff] }
 0x3f5   : > { %v1785_v10 = vadd.f32 %v1773_v18, %v631_v34  ;;  %v1751_v63 = vmul.f32 %v2233_v12, %v1739_v22  ;;  %v1729_v54 = vmul.f32 %v2237_v59, %v3802_v40  ;;  %2242 = vrcp.f32 %v1708_v1 }
 0x3f6   : > { %v1786_v16 = vadd.f32 %v1774_v29, %v633_v4  ;;  %v1752_v51 = vmul.f32 %v2235_v19, %v1740_v47  ;;  %v639_v38 = vadd.f32 %v4060_v31, %v467_v7  ;;  %v1765_v9 = vmul.f32 %v3791_v24, %v3748_v62 }
 0x3f7   : > { %v2239_v36 = vpop.eup %2238  ;;  %1797 = vst [vmem:[%s3822_s15 + $0x20] sm:$0xff] %v1785_v10  ;;  %v1775_v21 = vmul.f32 %v1763_v32, %v1751_v63  ;;  %v1741_v52 = vsub.f32 2.0, %v1729_v54  ;;  %v643_v30 = vadd.f32 %v4061_v60, %v472_v13  ;;  %v1766_v26 = vmul.f32 %v3806_v43, %v3750_v2  ;;  %v4063_v43 = vld [vmem:[#allocation36_spill] sm:$0xff] }
 0x3f8   : > { %1798 = vst [vmem:[%s3822_s15 + $0x28] sm:$0xff] %v1786_v16  ;;  %v1776_v45 = vmul.f32 %v1764_v11, %v1752_v51  ;;  %v1730_v40 = vmul.f32 %v2239_v36, %v3814_v44  ;;  %v645_v46 = vadd.f32 %v4062_v58, %v472_v13  ;;  %v1767_v19 = vmul.f32 %v3819_v3, %v3758_v14 }
 0x3f9   : > { %v1787_v20 = vadd.f32 %v1775_v21, %v637_v56  ;;  %v1753_v53 = vmul.f32 %v2237_v59, %v1741_v52  ;;  %v1768_v41 = vmul.f32 %v3832_v50, %v3765_v42  ;;  %v651_v17 = vadd.f32 %v4064_v55, %v477_v6 }
 0x3fa   : > { %v1788_v28 = vadd.f32 %v1776_v45, %v639_v38  ;;  %v1742_v57 = vsub.f32 2.0, %v1730_v40 }
 0x3fb   : > { %1799 = vst [vmem:[%s3822_s15 + $0x30] sm:$0xff] %v1787_v20  ;;  %v1777_v61 = vmul.f32 %v1765_v9, %v1753_v53 }
 0x3fc   : > { %v2241_v23 = vpop.eup %2240  ;;  %1800 = vst [vmem:[%s3822_s15 + $0x38] sm:$0xff] %v1788_v28  ;;  %v1754_v35 = vmul.f32 %v2239_v36, %v1742_v57 }
 0x3fd   : > { %v1789_v44 = vadd.f32 %v1777_v61, %v643_v30  ;;  %v1731_v27 = vmul.f32 %v2241_v23, %v1707_v49  ;;  %v649_v49 = vadd.f32 %v4063_v43, %v477_v6 }
 0x3fe   : > { %v1778_v12 = vmul.f32 %v1766_v26, %v1754_v35 }
 0x3ff   : > { %v2243_v62 = vpop.eup %2242  ;;  %1801 = vst [vmem:[%s3822_s15 + $0x40] sm:$0xff] %v1789_v44  ;;  %v1743_v24 = vsub.f32 2.0, %v1731_v27 }
 0x400   : > { %v1790_v15 = vadd.f32 %v1778_v12, %v645_v46  ;;  %v1732_v25 = vmul.f32 %v2243_v62, %v1708_v1 }
 0x401   : > { %v1755_v48 = vmul.f32 %v2241_v23, %v1743_v24 }
 0x402   : > { %1802 = vst [vmem:[%s3822_s15 + $0x48] sm:$0xff] %v1790_v15  ;;  %v1744_v2 = vsub.f32 2.0, %v1732_v25 }
 0x403   : > { %v1779_v0 = vmul.f32 %v1767_v19, %v1755_v48 }
 0x404   : > { %v1756_v39 = vmul.f32 %v2243_v62, %v1744_v2 }
 0x405   : > { %v1791_v5 = vadd.f32 %v1779_v0, %v649_v49 }
 0x406   : > { %v1780_v37 = vmul.f32 %v1768_v41, %v1756_v39 }
 0x407   : > { %1803 = vst [vmem:[%s3822_s15 + $0x50] sm:$0xff] %v1791_v5 }
 0x408   : > { %v1792_v14 = vadd.f32 %v1780_v37, %v651_v17 }
 0x40a   : > { %1804 = vst [vmem:[%s3822_s15 + $0x58] sm:$0xff] %v1792_v14 }
 0x40b   : > { %2257 = shalt.err (!%p2254_p3)
}
 0x40c   : > { %s2258_s26 = scalar_lea.hbm %s3872_s20, 1536  ;;  %s2262_s28 = scalar_lea.hbm %s3927_s6, 3072 }
 0x40d   : > { %p2259_p4 = scmp.ne.s32.totalorder %s3872_s20, %s2258_s26  ;;  %p2263_p9 = scmp.lt.u32.totalorder %s3872_s20, %s3927_s6 }
 0x40e   : > { %p2264_p10 = scmp.lt.u32.totalorder %s2262_s28, %s2258_s26  ;;  %p2266_p12 = scmp.lt.u32.totalorder %s2258_s26, %s3872_s20 }
 0x40f   : > { %p2260_p7 = pnand %p2259_p4, %p2394_p5 }
 0x410   : > { %p2265_p11 = por %p2264_p10, %p2263_p9 }
 0x411   : > { %p2261_p8 = pneg %p2260_p7 }
 0x412   : > { %p2267_p13 = por %p2266_p12, %p2265_p11 }
 0x414   : > { %p2268_p0 = pnand %p2267_p13, %p2261_p8 }
 0x416   : > { %2271 = shalt.err (!%p2268_p0)
}
 0x417   : > { %s2319_s17 = smov 256   ;;  %s2320_s19 = smov 512  }
 0x418   : > { %2095 = dma.vmem_to_hbm [thread:$0]  (%p2394_p5), %s3874_s16, 1536, %s3872_s20, %s3879_s25, %s2319_s17, %s2320_s19, %s2308_s14  }
 0x419 PF: > { %p2101_p1 = scmp.ge.s32.totalorder %s2306_s24, 2  ;;  %s1834_s9 = sand.u32 1, %s2294_s21  }
 0x41a   : > { %s1835_s10 = scalar_lea.sflag [#allocation3], %s1834_s9 }
 0x41b   : > { %p2098_p2 = pnand %p2101_p1, %p2398_p6 }
 0x41d   : > { %2289 = dma.done.wait (!%p2098_p2), %s1835_s10, 1536  }
 0x41e   : > { %2291 = vsyncadd (!%p2098_p2), %s1835_s10, 4294965760  ;;  %p16_p3 = scmp.ge.s32.totalorder %s2381_s27, 4   ;;  %s4065_s21 = smov %s2298_s22 }
 0x41f   : > { %s4066_s22 = smov %s2302_s23  ;;  %s4067_s23 = smov %s2392_s30 }
 0x420   : > { %s4068_s24 = smov %s2381_s27  ;;  %18 = sbr.rel (!%p16_p3) target bundleno = 3 (0x3), region = 81 }
 0x427   :  { %1840 = vsyncpa [#allocation3], 1 }
 0x428   :  { %1842 = vsyncpa [#allocation3 + $0x1], 1 }

</bundles_post_ra>
